<compile_context>
chip_gen: v6e
topology: v6e:2x2x1
jax: 0.10.0
libtpu: 0.0.40
codegen_flags: <defaults>
</compile_context>

<pallas_src>
import functools

import jax
import jax.numpy as jnp
from jax.experimental import pallas as pl
from jax.experimental.pallas import tpu as pltpu


def _upsample2x_kernel(x_ref, o_ref, *, w, half_stores):
    # x_ref: (R, W)   R rows of the flattened (N*C*H, W) input; W on lanes.
    # o_ref: (R, 4W)  per input row: [:, :2W] -> output row 2i, [:, 2W:] -> 2i+1.
    v = x_ref[...]                          # (R, W)
    v2 = jnp.repeat(v, 2, axis=-1)          # (R, 2W) lane interleave (XLU slot)
    if half_stores:
        # 2W is a multiple of 128 lanes: two aligned, dense stores.
        o_ref[:, : 2 * w] = v2
        o_ref[:, 2 * w:] = v2
    else:
        # Awkward W: keep the store lane-dense with one full-width store.
        o_ref[...] = jnp.concatenate([v2, v2], axis=-1)


def _pick_block_rows(total_rows, w, itemsize):
    """Rows of the flattened (N*C*H, W) input handled per grid step.

    Targets ~2 MiB of input per step (=> ~20 MiB pipelined: double-buffered
    input + double-buffered 4x-wide output, under the explicit 32 MiB VMEM
    limit on every generation), prefers a row count that divides the total
    (no masked partial last block), and keeps >= 2 grid steps whenever
    possible so both of v7x's TensorCores get work.
    """
    sub = 8 * max(1, 4 // itemsize)                 # sublane packing multiple
    target_bytes = 2 * 1024 * 1024
    r = max(1, target_bytes // max(1, w * itemsize))
    if r >= total_rows:
        r = total_rows
        # Degenerate single-step grid: split in two for v7x's second TensorCore
        # (costs at most one extra ~0.35 us step on v5e/v6e).
        if total_rows >= 2 * sub:
            half = -(-total_rows // 2)
            r = -(-half // sub) * sub
    else:
        r = max(sub, (r // sub) * sub)
        # Prefer a block height dividing the total rows (no padded partial
        # block), as long as it costs at most a 2x smaller block.
        cand = r
        while cand >= sub and 2 * cand >= r:
            if total_rows % cand == 0:
                r = cand
                break
            cand -= sub
    return min(r, total_rows)


def upsample_nearest_2x(x_nchw):
    """x_nchw: (N, C, H, W) -> (N, C, 2H, 2W), nearest-neighbor (scale_factor=2)."""
    n, c, h, w = x_nchw.shape
    rows = n * c * h
    itemsize = jnp.dtype(x_nchw.dtype).itemsize
    r = _pick_block_rows(rows, w, itemsize)

    xr = x_nchw.reshape(rows, w)            # free, contiguous reshape (no transpose)

    kernel = functools.partial(_upsample2x_kernel, w=w,
                               half_stores=(w % 64 == 0))

    z = pl.pallas_call(
        kernel,
        out_shape=jax.ShapeDtypeStruct((rows, 4 * w), x_nchw.dtype),
        grid_spec=pltpu.PrefetchScalarGridSpec(
            num_scalar_prefetch=0,
            grid=(pl.cdiv(rows, r),),
            in_specs=[pl.BlockSpec((r, w), lambda i: (i, 0))],
            out_specs=pl.BlockSpec((r, 4 * w), lambda i: (i, 0)),
        ),
        compiler_params=pltpu.CompilerParams(
            dimension_semantics=("parallel",),
            vmem_limit_bytes=32 * 1024 * 1024),     # explicit budget (>= v5e's 16 MiB default, < v7x's 64 MiB physical)
        cost_estimate=pl.CostEstimate(
            flops=0,
            transcendentals=0,
            bytes_accessed=5 * x_nchw.size * itemsize),  # 1x read + 4x write
    )(xr)

    # Free, contiguous reshape: (N*C*H, [row 2i | row 2i+1]) -> (N, C, 2H, 2W).
    return z.reshape(n, c, 2 * h, 2 * w)


if __name__ == "__main__":
    key = jax.random.PRNGKey(0)
    x = jax.random.normal(key, (2, 4, 16, 16), dtype=jnp.float32)  # NCHW

    y = upsample_nearest_2x(x)
    y = jax.block_until_ready(y)

    # Reference: nearest upsample == repeat each spatial element twice.
    ref = jnp.repeat(jnp.repeat(x, 2, axis=2), 2, axis=3)

    assert y.shape == (2, 4, 32, 32), y.shape
    assert y.dtype == x.dtype
    assert jnp.allclose(y, ref), "mismatch vs reference nearest upsample"

    print("KERNEL_OK")
</pallas_src>

<mosaic_0001>
module attributes {stable_mosaic.version = 11 : i64} {
  func.func @_upsample2x_kernel(%arg0: i32, %arg1: memref<64x16xf32, #tpu.memory_space<vmem>>, %arg2: memref<64x64xf32, #tpu.memory_space<vmem>>) attributes {dimension_semantics = [#tpu.dimension_semantics<parallel>], iteration_bounds = array<i64: 2>, scalar_prefetch = 0 : i64, scratch_operands = 0 : i64, tpu.core_type = #tpu.core_type<tc>, window_params = [{transform_indices = @transform_0, window_bounds = array<i64: 64, 16>}, {transform_indices = @transform_1, window_bounds = array<i64: 64, 64>}]} {
    %c0 = arith.constant 0 : index
    %c0_0 = arith.constant 0 : index
    %0 = vector.load %arg1[%c0, %c0_0] : memref<64x16xf32, #tpu.memory_space<vmem>>, vector<64x16xf32>
    %1 = vector.shape_cast %0 : vector<64x16xf32> to vector<64x16x1xf32>
    %2 = vector.broadcast %1 : vector<64x16x1xf32> to vector<64x16x2xf32>
    %3 = vector.shape_cast %2 : vector<64x16x2xf32> to vector<64x32xf32>
    %4 = tpu.concatenate %3, %3 in 1 : vector<64x32xf32>, vector<64x32xf32> -> vector<64x64xf32>
    %c0_1 = arith.constant 0 : index
    %c0_2 = arith.constant 0 : index
    %5 = vector.load %arg2[%c0_1, %c0_2] : memref<64x64xf32, #tpu.memory_space<vmem>>, vector<64x64xf32>
    tpu.vector_store %arg2[%c0_1, %c0_2], %4 {strides = array<i32>} : memref<64x64xf32, #tpu.memory_space<vmem>>, vector<64x64xf32>,
    return
  }
  func.func @transform_0(%arg0: i32) -> (i32, i32) {
    %c0_i32 = arith.constant 0 : i32
    %c0_i32_0 = arith.constant 0 : i32
    return %arg0, %c0_i32 : i32, i32
  }
  func.func @transform_1(%arg0: i32) -> (i32, i32) {
    %c0_i32 = arith.constant 0 : i32
    %c0_i32_0 = arith.constant 0 : i32
    return %arg0, %c0_i32 : i32, i32
  }
}

</mosaic_0001>

<bundles_post_ra>
// kernel: tpu_custom_call.1
= control target key start
LH: loop header
LB: loop body
LE: loop exit
PB: predicated region body
PF: predicated region fallthrough
CT: control target
= control target key end

     0   :  { %s3802_s6 = smov 0   ;;  %s5984_s0 = inlined_call_operand.vmem [shape: f32[128,16], index: 0, kind: input, shape index: {}]   ;;  %s5985_s1 = inlined_call_operand.vmem [shape: f32[128,64], index: 1, kind: output, shape index: {}]  }
   0x1 LB: > { %s3729_s7 = sadd.s32 4294967295, %s3772_s6   ;;  %p3733_p0 = scmp.ge.s32.totalorder %s3772_s6, 1  ;;  %s3772_s6 = sphi %s3802_s6, %s11_s6  }
   0x2   : > { %p88_p1 = scmp.lt.s32.totalorder %s3772_s6, 3 }
   0x4   : > { %p89_p2 = pnand %p3733_p0, %p88_p1 }
   0x6   : > { %92 = sbr.rel (%p89_p2) target bundleno = 854 (0x356), region = 24 }
   0xb   : > { %s3734_s8 = sshll.u32 %s3729_s7, 3  ;;  %v128_v0 = vlaneseq  ;;  %v3774_v47 = vmov 1983009808   ;;  %s3776_s13 = smov 2   ;;  %vm3488_vm0 = vcmask 15360   ;;  %vm3497_vm1 = vcmask 31744  }
   0xc   : > { %p109_p3 = scmp.lt.s32.totalorder %s3734_s8, 15  ;;  %v835_v48 = vunpack.c.l.s4 %v3774_v47  ;;  %s3777_s14 = smov 4   ;;  %vm3506_vm2 = vcmask 48128   ;;  %vm3515_vm3 = vcmask 64512   ;;  %vm3524_vm4 = vcmask 80896  }
   0xd   : > { %v3810_v1 = vshrl.u32 %v128_v0, 7  ;;  %s3778_s15 = smov 6   ;;  %s3779_s16 = smov 8   ;;  %vm3533_vm5 = vcmask 97280   ;;  %vm3542_vm6 = vcmask 113664   ;;  %vm3551_vm7 = vcmask 130048  }
   0xe   : > { %s6377_s8 = smov (!%p109_p3, %s3734_s8), 15  ;;  %v836_v53 = vunpack.c.0.s8 %v835_v48  ;;  %s3780_s17 = smov 10   ;;  %vm3560_vm8 = vcmask 146432   ;;  %vm3569_vm9 = vcmask 162816   ;;  %vm3578_vm10 = vcmask 179200  }
   0xf   : > { %v3815_v2 = vsub.s32 1, %v3810_v1  ;;  %v3818_v3 = vsub.s32 0, %v3810_v1  ;;  %s3735_s9 = sshll.u32 %s6377_s8, 3  ;;  %v3832_v7 = vsub.s32 2, %v3810_v1  ;;  %v3836_v9 = vsub.s32 3, %v3810_v1  ;;  %s3781_s18 = smov 12  }
  0x10   : > { %s3826_s12 = scalar_lea.vmem %s5984_s0, %s3735_s9  ;;  %v3840_v11 = vsub.s32 4, %v3810_v1  ;;  %v3844_v13 = vsub.s32 5, %v3810_v1  ;;  %v3848_v15 = vsub.s32 6, %v3810_v1  ;;  %v3852_v17 = vsub.s32 7, %v3810_v1  ;;  %s3782_s19 = smov 14  }
  0x11   : > { %v120_v4 = vld [vmem:[%s3826_s12] sm:$0xff]  ;;  %v121_v19 = vld [vmem:[%s3826_s12 + $0x8] sm:$0xff]  ;;  %v122_v28 = vld [vmem:[%s3826_s12 + $0x10] sm:$0xff]  ;;  %v3897_v57 = vsub.s32 %v836_v53, %v3810_v1  ;;  %s3783_s20 = smov 16   ;;  %s3784_s21 = smov 18   ;;  %vm3587_vm11 = vcmask 195584  }
  0x12   : > { %v142_v5 = vrot.slane %v120_v4, %v3815_v2  ;;  %v131_v6 = vrot.slane %v120_v4, %v3818_v3  ;;  %v153_v8 = vrot.slane %v120_v4, %v3832_v7  ;;  %v164_v10 = vrot.slane %v120_v4, %v3836_v9  ;;  %v123_v37 = vld [vmem:[%s3826_s12 + $0x18] sm:$0xff]  ;;  %v124_v52 = vld [vmem:[%s3826_s12 + $0x20] sm:$0xff]  ;;  %v125_v48 = vld [vmem:[%s3826_s12 + $0x28] sm:$0xff]  ;;  %s3785_s22 = smov 20   ;;  %s3786_s23 = smov 22  }
  0x13   : > { %v175_v12 = vrot.slane %v120_v4, %v3840_v11  ;;  %v186_v14 = vrot.slane %v120_v4, %v3844_v13  ;;  %v197_v16 = vrot.slane %v120_v4, %v3848_v15  ;;  %v208_v18 = vrot.slane %v120_v4, %v3852_v17  ;;  %s3787_s24 = smov 24   ;;  %s3788_s25 = smov 26  }
  0x14   : > { %144 = vbcast.lane.b32.xlu1 %v142_v5, 256  ;;  %133 = vbcast.lane.b32.xlu0 %v131_v6, 256  ;;  %v219_v20 = vrot.slane %v121_v19, %v3818_v3  ;;  %v230_v21 = vrot.slane %v121_v19, %v3815_v2  ;;  %v241_v22 = vrot.slane %v121_v19, %v3832_v7  ;;  %s3789_s26 = smov 28   ;;  %s3790_s27 = smov 30   ;;  %vm3596_vm12 = vcmask 211968  }
  0x15   : > { %v252_v23 = vrot.slane %v121_v19, %v3836_v9  ;;  %v263_v24 = vrot.slane %v121_v19, %v3840_v11  ;;  %v274_v25 = vrot.slane %v121_v19, %v3844_v13  ;;  %v285_v26 = vrot.slane %v121_v19, %v3848_v15  ;;  %s3791_s28 = smov 32   ;;  %s118_s2 = scalar_lea.vmem %s5985_s1, %s3735_s9 }
  0x16   : > { %v296_v27 = vrot.slane %v121_v19, %v3852_v17  ;;  %v307_v29 = vrot.slane %v122_v28, %v3818_v3  ;;  %v318_v30 = vrot.slane %v122_v28, %v3815_v2  ;;  %v329_v31 = vrot.slane %v122_v28, %v3832_v7 }
  0x17   : > { %v340_v32 = vrot.slane %v122_v28, %v3836_v9  ;;  %v351_v33 = vrot.slane %v122_v28, %v3840_v11  ;;  %v362_v34 = vrot.slane %v122_v28, %v3844_v13  ;;  %v373_v35 = vrot.slane %v122_v28, %v3848_v15 }
  0x18   : > { %148 = vbcast.lane.b32.xlu1 %v142_v5, 264  ;;  %137 = vbcast.lane.b32.xlu0 %v131_v6, 264  ;;  %v384_v36 = vrot.slane %v122_v28, %v3852_v17  ;;  %v395_v38 = vrot.slane %v123_v37, %v3818_v3  ;;  %v406_v39 = vrot.slane %v123_v37, %v3815_v2  ;;  %vm3605_vm13 = vcmask 228352  }
  0x19   : > { %v417_v40 = vrot.slane %v123_v37, %v3832_v7  ;;  %v428_v41 = vrot.slane %v123_v37, %v3836_v9  ;;  %v439_v42 = vrot.slane %v123_v37, %v3840_v11  ;;  %v450_v43 = vrot.slane %v123_v37, %v3844_v13 }
  0x1a   : > { %v461_v46 = vrot.slane %v123_v37, %v3848_v15  ;;  %v472_v51 = vrot.slane %v123_v37, %v3852_v17  ;;  %v483_v56 = vrot.slane %v124_v52, %v3818_v3  ;;  %v494_v62 = vrot.slane %v124_v52, %v3815_v2 }
  0x1b   : > { %vm3614_vm14 = vcmask 244736   ;;  %vm3655_vm15 = vcmask 261120  }
  0x1c   : > { %159 = vbcast.lane.b32.xlu1 %v153_v8, 264  ;;  %155 = vbcast.lane.b32.xlu0 %v153_v8, 256  ;;  %v505_v8 = vrot.slane %v124_v52, %v3832_v7 }
  0x20   : > { %170 = vbcast.lane.b32.xlu1 %v164_v10, 264  ;;  %166 = vbcast.lane.b32.xlu0 %v164_v10, 256 }
  0x24   : > { %181 = vbcast.lane.b32.xlu1 %v175_v12, 264  ;;  %177 = vbcast.lane.b32.xlu0 %v175_v12, 256 }
  0x28   : > { %192 = vbcast.lane.b32.xlu1 %v186_v14, 264  ;;  %188 = vbcast.lane.b32.xlu0 %v186_v14, 256  ;;  %v516_v14 = vrot.slane %v124_v52, %v3836_v9 }
  0x2c   : > { %203 = vbcast.lane.b32.xlu1 %v197_v16, 264  ;;  %199 = vbcast.lane.b32.xlu0 %v197_v16, 256  ;;  %v3775_v16 = vmov 1934713408  }
  0x30   : > { %214 = vbcast.lane.b32.xlu1 %v208_v18, 264  ;;  %210 = vbcast.lane.b32.xlu0 %v208_v18, 256  ;;  %v899_v18 = vunpack.c.l.s4 %v3775_v16  ;;  %v593_v16 = vrot.slane %v125_v48, %v3832_v7 }
  0x34   : > { %225 = vbcast.lane.b32.xlu1 %v219_v20, 264  ;;  %221 = vbcast.lane.b32.xlu0 %v219_v20, 256 }
  0x38   : > { %236 = vbcast.lane.b32.xlu1 %v230_v21, 264  ;;  %232 = vbcast.lane.b32.xlu0 %v230_v21, 256  ;;  %v527_v21 = vrot.slane %v124_v52, %v3840_v11 }
  0x3c   : > { %247 = vbcast.lane.b32.xlu1 %v241_v22, 264  ;;  %243 = vbcast.lane.b32.xlu0 %v241_v22, 256  ;;  %v900_v22 = vunpack.c.0.s8 %v899_v18 }
  0x40   : > { %258 = vbcast.lane.b32.xlu1 %v252_v23, 264  ;;  %254 = vbcast.lane.b32.xlu0 %v252_v23, 256 }
  0x44   : > { %269 = vbcast.lane.b32.xlu1 %v263_v24, 264  ;;  %265 = vbcast.lane.b32.xlu0 %v263_v24, 256 }
  0x48   : > { %280 = vbcast.lane.b32.xlu1 %v274_v25, 264  ;;  %276 = vbcast.lane.b32.xlu0 %v274_v25, 256 }
  0x4c   : > { %291 = vbcast.lane.b32.xlu1 %v285_v26, 264  ;;  %287 = vbcast.lane.b32.xlu0 %v285_v26, 256 }
  0x50   : > { %302 = vbcast.lane.b32.xlu1 %v296_v27, 264  ;;  %298 = vbcast.lane.b32.xlu0 %v296_v27, 256  ;;  %v538_v27 = vrot.slane %v124_v52, %v3844_v13 }
  0x54   : > { %313 = vbcast.lane.b32.xlu1 %v307_v29, 264  ;;  %309 = vbcast.lane.b32.xlu0 %v307_v29, 256  ;;  %v3936_v29 = vsub.s32 %v900_v22, %v3810_v1  ;;  %v604_v22 = vrot.slane %v125_v48, %v3836_v9 }
  0x58   : > { %324 = vbcast.lane.b32.xlu1 %v318_v30, 264  ;;  %320 = vbcast.lane.b32.xlu0 %v318_v30, 256 }
  0x5c   : > { %335 = vbcast.lane.b32.xlu1 %v329_v31, 264  ;;  %331 = vbcast.lane.b32.xlu0 %v329_v31, 256 }
  0x60   : > { %346 = vbcast.lane.b32.xlu1 %v340_v32, 264  ;;  %342 = vbcast.lane.b32.xlu0 %v340_v32, 256 }
  0x64   : > { %357 = vbcast.lane.b32.xlu1 %v351_v33, 264  ;;  %353 = vbcast.lane.b32.xlu0 %v351_v33, 256 }
  0x68   : > { %368 = vbcast.lane.b32.xlu1 %v362_v34, 264  ;;  %364 = vbcast.lane.b32.xlu0 %v362_v34, 256 }
  0x6c   : > { %379 = vbcast.lane.b32.xlu1 %v373_v35, 264  ;;  %375 = vbcast.lane.b32.xlu0 %v373_v35, 256 }
  0x70   : > { %390 = vbcast.lane.b32.xlu1 %v384_v36, 264  ;;  %386 = vbcast.lane.b32.xlu0 %v384_v36, 256  ;;  %v549_v36 = vrot.slane %v124_v52, %v3848_v15 }
  0x74   : > { %401 = vbcast.lane.b32.xlu1 %v395_v38, 264  ;;  %397 = vbcast.lane.b32.xlu0 %v395_v38, 256 }
  0x78   : > { %412 = vbcast.lane.b32.xlu1 %v406_v39, 264  ;;  %408 = vbcast.lane.b32.xlu0 %v406_v39, 256 }
  0x7c   : > { %423 = vbcast.lane.b32.xlu1 %v417_v40, 264  ;;  %419 = vbcast.lane.b32.xlu0 %v417_v40, 256 }
  0x80   : > { %434 = vbcast.lane.b32.xlu1 %v428_v41, 264  ;;  %430 = vbcast.lane.b32.xlu0 %v428_v41, 256 }
  0x84   : > { %445 = vbcast.lane.b32.xlu1 %v439_v42, 264  ;;  %441 = vbcast.lane.b32.xlu0 %v439_v42, 256  ;;  %v560_v42 = vrot.slane %v124_v52, %v3852_v17 }
  0x86   : > { %v3880_v44 = vpop.permute.xlu1 %144  ;;  %v3882_v45 = vpop.permute.xlu0 %133 }
  0x88   : > { %456 = vbcast.lane.b32.xlu1 %v450_v43, 264  ;;  %452 = vbcast.lane.b32.xlu0 %v450_v43, 256 }
  0x8a   : > { %v3885_v49 = vpop.permute.xlu1 %148  ;;  %v3887_v50 = vpop.permute.xlu0 %137 }
  0x8b   : > { %6090 = vst [vmem:[#allocation2_spill] sm:$0xff] %v3885_v49  ;;  %6091 = vst [vmem:[#allocation3_spill] sm:$0xff] %v3887_v50 }
  0x8c   : > { %467 = vbcast.lane.b32.xlu1 %v461_v46, 264  ;;  %463 = vbcast.lane.b32.xlu0 %v461_v46, 256 }
  0x8e   : > { %v3891_v54 = vpop.permute.xlu1 %159  ;;  %v3893_v55 = vpop.permute.xlu0 %155 }
  0x8f   : > { %6092 = vst [vmem:[#allocation4_spill] sm:$0xff] %v3891_v54  ;;  %v832_v58 = vcombine.low %v3882_v45, %v3893_v55 }
  0x90   : > { %478 = vbcast.lane.b32.xlu1 %v472_v51, 264  ;;  %474 = vbcast.lane.b32.xlu0 %v472_v51, 256 }
  0x91   : > { %v840_v0 = vrot.slane %v832_v58, %v3897_v57 }
  0x92   : > { %v3901_v59 = vpop.permute.xlu1 %170  ;;  %v3903_v60 = vpop.permute.xlu0 %166 }
  0x93   : > { %6093 = vst [vmem:[#allocation5_spill] sm:$0xff] %v3901_v59  ;;  %v848_v61 = vcombine.low %v3880_v44, %v3903_v60 }
  0x94   : > { %489 = vbcast.lane.b32.xlu1 %v483_v56, 264  ;;  %485 = vbcast.lane.b32.xlu0 %v483_v56, 256  ;;  %v571_v56 = vrot.slane %v125_v48, %v3818_v3 }
  0x95   : > { %v856_v63 = vrot.slane %v848_v61, %v3897_v57 }
  0x96   : > { %v3910_v4 = vpop.permute.xlu1 %181  ;;  %v3912_v5 = vpop.permute.xlu0 %177 }
  0x97   : > { %6094 = vst [vmem:[#allocation6_spill] sm:$0xff] %v3910_v4  ;;  %v897_v6 = vcombine.high %v840_v0, %v856_v63  ;;  %v896_v30 = vcombine.low %v840_v0, %v856_v63  ;;  %v582_v63 = vrot.slane %v125_v48, %v3815_v2 }
  0x98   : > { %500 = vbcast.lane.b32.xlu1 %v494_v62, 264  ;;  %496 = vbcast.lane.b32.xlu0 %v494_v62, 256 }
  0x99   : > { %v3949_v1 = vrot.slane %v896_v30, %v3936_v29  ;;  %v3955_v40 = vrot.slane %v897_v6, %v3936_v29 }
  0x9a   : > { %v3915_v10 = vpop.permute.xlu1 %192  ;;  %v3917_v12 = vpop.permute.xlu0 %188 }
  0x9b   : > { %6095 = vst [vmem:[#allocation7_spill] sm:$0xff] %v3915_v10  ;;  %6102 = vst [vmem:[#allocation14_spill] sm:$0xff] %v3949_v1 }
  0x9c   : > { %511 = vbcast.lane.b32.xlu1 %v505_v8, 264  ;;  %507 = vbcast.lane.b32.xlu0 %v505_v8, 256 }
  0x9e   : > { %v3920_v19 = vpop.permute.xlu1 %203  ;;  %v3922_v20 = vpop.permute.xlu0 %199 }
  0x9f   : > { %6096 = vst [vmem:[#allocation8_spill] sm:$0xff] %v3920_v19  ;;  %v864_v23 = vcombine.low %v3912_v5, %v3922_v20 }
  0xa0   : > { %522 = vbcast.lane.b32.xlu1 %v516_v14, 264  ;;  %518 = vbcast.lane.b32.xlu0 %v516_v14, 256 }
  0xa1   : > { %v872_v31 = vrot.slane %v864_v23, %v3897_v57 }
  0xa2   : > { %v3927_v24 = vpop.permute.xlu1 %214  ;;  %v3929_v25 = vpop.permute.xlu0 %210 }
  0xa3   : > { %6097 = vst [vmem:[#allocation9_spill] sm:$0xff] %v3927_v24  ;;  %v880_v26 = vcombine.low %v3917_v12, %v3929_v25 }
  0xa4   : > { %533 = vbcast.lane.b32.xlu1 %v527_v21, 264  ;;  %529 = vbcast.lane.b32.xlu0 %v527_v21, 256 }
  0xa5   : > { %v888_v28 = vrot.slane %v880_v26, %v3897_v57 }
  0xa6   : > { %v3939_v32 = vpop.permute.xlu1 %225  ;;  %v3941_v33 = vpop.permute.xlu0 %221 }
  0xa7   : > { %6098 = vst [vmem:[#allocation10_spill] sm:$0xff] %v3939_v32  ;;  %6099 = vst [vmem:[#allocation11_spill] sm:$0xff] %v3941_v33  ;;  %v928_v34 = vcombine.low %v872_v31, %v888_v28  ;;  %v929_v35 = vcombine.high %v872_v31, %v888_v28 }
  0xa8   : > { %544 = vbcast.lane.b32.xlu1 %v538_v27, 264  ;;  %540 = vbcast.lane.b32.xlu0 %v538_v27, 256  ;;  %v615_v27 = vrot.slane %v125_v48, %v3840_v11 }
  0xa9   : > { %v3952_v39 = vrot.slane %v928_v34, %v3936_v29  ;;  %v3958_v41 = vrot.slane %v929_v35, %v3936_v29  ;;  %v626_v34 = vrot.slane %v125_v48, %v3844_v13 }
  0xaa   : > { %v3944_v37 = vpop.permute.xlu1 %236  ;;  %v3946_v38 = vpop.permute.xlu0 %232 }
  0xab   : > { %6100 = vst [vmem:[#allocation12_spill] sm:$0xff] %v3944_v37  ;;  %6101 = vst [vmem:[#allocation13_spill] sm:$0xff] %v3946_v38 }
  0xac   : > { %6103 = vst [vmem:[#allocation15_spill] sm:$0xff] %v3952_v39  ;;  %555 = vbcast.lane.b32.xlu1 %v549_v36, 264  ;;  %551 = vbcast.lane.b32.xlu0 %v549_v36, 256 }
  0xae   : > { %v3968_v51 = vpop.permute.xlu1 %247  ;;  %v3970_v53 = vpop.permute.xlu0 %243 }
  0xaf   : > { %6104 = vst [vmem:[#allocation16_spill] sm:$0xff] %v3968_v51  ;;  %6105 = vst [vmem:[#allocation17_spill] sm:$0xff] %v3970_v53  ;;  %v968_v52 = vcombine.low %v3941_v33, %v3970_v53 }
  0xb0   : > { %566 = vbcast.lane.b32.xlu1 %v560_v42, 264  ;;  %562 = vbcast.lane.b32.xlu0 %v560_v42, 256 }
  0xb1   : > { %v976_v6 = vrot.slane %v968_v52, %v3897_v57 }
  0xb2   : > { %v3975_v58 = vpop.permute.xlu0 %254  ;;  %v3977_v61 = vpop.permute.xlu1 %258 }
  0xb3   : > { %6106 = vst [vmem:[#allocation18_spill] sm:$0xff] %v3975_v58  ;;  %6107 = vst [vmem:[#allocation19_spill] sm:$0xff] %v3977_v61  ;;  %v984_v62 = vcombine.low %v3946_v38, %v3975_v58 }
  0xb4   : > { %577 = vbcast.lane.b32.xlu1 %v571_v56, 264  ;;  %573 = vbcast.lane.b32.xlu0 %v571_v56, 256 }
  0xb5   : > { %v992_v0 = vrot.slane %v984_v62, %v3897_v57 }
  0xb6   : > { %v3984_v8 = vpop.permute.xlu0 %265  ;;  %v3987_v18 = vpop.permute.xlu1 %269 }
  0xb7   : > { %6108 = vst [vmem:[#allocation20_spill] sm:$0xff] %v3984_v8  ;;  %v1033_v14 = vcombine.high %v976_v6, %v992_v0  ;;  %6109 = vst [vmem:[#allocation21_spill] sm:$0xff] %v3987_v18  ;;  %v1032_v42 = vcombine.low %v976_v6, %v992_v0 }
  0xb8   : > { %588 = vbcast.lane.b32.xlu1 %v582_v63, 264  ;;  %584 = vbcast.lane.b32.xlu0 %v582_v63, 256 }
  0xb9   : > { %v4014_v47 = vrot.slane %v1032_v42, %v3936_v29  ;;  %v4020_v0 = vrot.slane %v1033_v14, %v3936_v29  ;;  %v126_v14 = vld [vmem:[%s3826_s12 + $0x30] sm:$0xff] }
  0xba   : > { %v3989_v21 = vpop.permute.xlu0 %276  ;;  %v3994_v26 = vpop.permute.xlu1 %280  ;;  %v714_v51 = vrot.slane %v126_v14, %v3844_v13 }
  0xbb   : > { %6110 = vst [vmem:[#allocation22_spill] sm:$0xff] %v3989_v21  ;;  %6112 = vst [vmem:[#allocation24_spill] sm:$0xff] %v3994_v26 }
  0xbc   : > { %599 = vbcast.lane.b32.xlu1 %v593_v16, 264  ;;  %595 = vbcast.lane.b32.xlu0 %v593_v16, 256  ;;  %v637_v16 = vrot.slane %v125_v48, %v3848_v15  ;;  %6114 = vst [vmem:[#allocation26_spill] sm:$0xff] %v4014_v47 }
  0xbe   : > { %v3992_v23 = vpop.permute.xlu0 %287  ;;  %v4004_v35 = vpop.permute.xlu1 %291 }
  0xbf   : > { %6111 = vst [vmem:[#allocation23_spill] sm:$0xff] %v3992_v23  ;;  %v1000_v28 = vcombine.low %v3984_v8, %v3992_v23  ;;  %6113 = vst [vmem:[#allocation25_spill] sm:$0xff] %v4004_v35  ;;  %v692_v35 = vrot.slane %v126_v14, %v3836_v9 }
  0xc0   : > { %610 = vbcast.lane.b32.xlu1 %v604_v22, 264  ;;  %606 = vbcast.lane.b32.xlu0 %v604_v22, 256 }
  0xc1   : > { %v1008_v56 = vrot.slane %v1000_v28, %v3897_v57  ;;  %v648_v28 = vrot.slane %v125_v48, %v3852_v17 }
  0xc2   : > { %v3999_v30 = vpop.permute.xlu0 %298 }
  0xc3   : > { %v1016_v31 = vcombine.low %v3989_v21, %v3999_v30 }
  0xc4   : > { %621 = vbcast.lane.b32.xlu1 %v615_v27, 264  ;;  %617 = vbcast.lane.b32.xlu0 %v615_v27, 256  ;;  %v4025_v27 = vpop.permute.xlu1 %302 }
  0xc5   : > { %v1024_v36 = vrot.slane %v1016_v31, %v3897_v57  ;;  %6116 = vst [vmem:[#allocation28_spill] sm:$0xff] %v4025_v27  ;;  %v681_v27 = vrot.slane %v126_v14, %v3832_v7 }
  0xc6   : > { %v4008_v52 = vpop.permute.xlu0 %309 }
  0xc7   : > { %v1064_v62 = vcombine.low %v1008_v56, %v1024_v36  ;;  %v1065_v63 = vcombine.high %v1008_v56, %v1024_v36 }
  0xc8   : > { %632 = vbcast.lane.b32.xlu1 %v626_v34, 264  ;;  %628 = vbcast.lane.b32.xlu0 %v626_v34, 256 }
  0xc9   : > { %v4017_v31 = vrot.slane %v1064_v62, %v3936_v29  ;;  %v4023_v6 = vrot.slane %v1065_v63, %v3936_v29  ;;  %v659_v62 = vrot.slane %v126_v14, %v3818_v3  ;;  %v4038_v63 = vpop.permute.xlu1 %313 }
  0xca   : > { %v4011_v22 = vpop.permute.xlu0 %320  ;;  %6117 = vst [vmem:[#allocation29_spill] sm:$0xff] %v4038_v63 }
  0xcb   : > { %6115 = vst [vmem:[#allocation27_spill] sm:$0xff] %v4017_v31 }
  0xcc   : > { %643 = vbcast.lane.b32.xlu1 %v637_v16, 264  ;;  %639 = vbcast.lane.b32.xlu0 %v637_v16, 256  ;;  %v670_v16 = vrot.slane %v126_v14, %v3815_v2 }
  0xcd   : > { %v4051_v26 = vpop.permute.xlu1 %324 }
  0xce   : > { %v4035_v56 = vpop.permute.xlu0 %331  ;;  %6118 = vst [vmem:[#allocation30_spill] sm:$0xff] %v4051_v26 }
  0xcf   : > { %v1104_v48 = vcombine.low %v4008_v52, %v4035_v56 }
  0xd0   : > { %654 = vbcast.lane.b32.xlu1 %v648_v28, 264  ;;  %650 = vbcast.lane.b32.xlu0 %v648_v28, 256 }
  0xd1   : > { %v1112_v46 = vrot.slane %v1104_v48, %v3897_v57  ;;  %v4057_v37 = vpop.permute.xlu1 %335 }
  0xd2   : > { %v4042_v34 = vpop.permute.xlu0 %342  ;;  %6119 = vst [vmem:[#allocation31_spill] sm:$0xff] %v4057_v37 }
  0xd3   : > { %v1120_v36 = vcombine.low %v4011_v22, %v4042_v34 }
  0xd4   : > { %665 = vbcast.lane.b32.xlu1 %v659_v62, 264  ;;  %661 = vbcast.lane.b32.xlu0 %v659_v62, 256  ;;  %v703_v62 = vrot.slane %v126_v14, %v3840_v11 }
  0xd5   : > { %v1128_v42 = vrot.slane %v1120_v36, %v3897_v57 }
  0xd6   : > { %v4049_v43 = vpop.permute.xlu0 %353 }
  0xd7   : > { %v1169_v28 = vcombine.high %v1112_v46, %v1128_v42  ;;  %v1168_v26 = vcombine.low %v1112_v46, %v1128_v42 }
  0xd8   : > { %676 = vbcast.lane.b32.xlu1 %v670_v16, 264  ;;  %672 = vbcast.lane.b32.xlu0 %v670_v16, 256  ;;  %v4066_v16 = vpop.permute.xlu1 %346 }
  0xd9   : > { %6120 = vst [vmem:[#allocation32_spill] sm:$0xff] %v4066_v16  ;;  %v725_v16 = vrot.slane %v126_v14, %v3848_v15  ;;  %v4081_v24 = vrot.slane %v1168_v26, %v3936_v29  ;;  %v4087_v46 = vrot.slane %v1169_v28, %v3936_v29 }
  0xda   : > { %v4054_v18 = vpop.permute.xlu0 %364 }
  0xdb   : > { %6124 = vst [vmem:[#allocation36_spill] sm:$0xff] %v4081_v24 }
  0xdc   : > { %687 = vbcast.lane.b32.xlu1 %v681_v27, 264  ;;  %683 = vbcast.lane.b32.xlu0 %v681_v27, 256  ;;  %v4076_v54 = vpop.permute.xlu1 %357 }
  0xdd   : > { %6122 = vst [vmem:[#allocation34_spill] sm:$0xff] %v4076_v54 }
  0xde   : > { %v4059_v36 = vpop.permute.xlu0 %375 }
  0xdf   : > { %v1136_v48 = vcombine.low %v4049_v43, %v4059_v36 }
  0xe0   : > { %698 = vbcast.lane.b32.xlu1 %v692_v35, 264  ;;  %694 = vbcast.lane.b32.xlu0 %v692_v35, 256  ;;  %v4102_v28 = vpop.permute.xlu1 %368 }
  0xe1   : > { %v1144_v63 = vrot.slane %v1136_v48, %v3897_v57  ;;  %6127 = vst [vmem:[#allocation39_spill] sm:$0xff] %v4102_v28 }
  0xe2   : > { %v4064_v61 = vpop.permute.xlu0 %386 }
  0xe3   : > { %v1152_v32 = vcombine.low %v4054_v18, %v4064_v61 }
  0xe4   : > { %709 = vbcast.lane.b32.xlu1 %v703_v62, 264  ;;  %705 = vbcast.lane.b32.xlu0 %v703_v62, 256  ;;  %v4112_v26 = vpop.permute.xlu1 %379 }
  0xe5   : > { %v1160_v27 = vrot.slane %v1152_v32, %v3897_v57  ;;  %6129 = vst [vmem:[#allocation41_spill] sm:$0xff] %v4112_v26 }
  0xe6   : > { %v4073_v35 = vpop.permute.xlu0 %397 }
  0xe7   : > { %6121 = vst [vmem:[#allocation33_spill] sm:$0xff] %v4073_v35  ;;  %v1200_v37 = vcombine.low %v1144_v63, %v1160_v27  ;;  %v1201_v50 = vcombine.high %v1144_v63, %v1160_v27  ;;  %v736_v63 = vrot.slane %v126_v14, %v3852_v17 }
  0xe8   : > { %720 = vbcast.lane.b32.xlu1 %v714_v51, 264  ;;  %716 = vbcast.lane.b32.xlu0 %v714_v51, 256  ;;  %v4121_v19 = vpop.permute.xlu1 %390 }
  0xe9   : > { %v4084_v32 = vrot.slane %v1200_v37, %v3936_v29  ;;  %v4090_v42 = vrot.slane %v1201_v50, %v3936_v29  ;;  %v127_v37 = vld [vmem:[%s3826_s12 + $0x38] sm:$0xff]  ;;  %6132 = vst [vmem:[#allocation44_spill] sm:$0xff] %v4121_v19 }
  0xea   : > { %v4078_v10 = vpop.permute.xlu0 %408  ;;  %v747_v50 = vrot.slane %v127_v37, %v3818_v3  ;;  %v769_v54 = vrot.slane %v127_v37, %v3832_v7 }
  0xeb   : > { %6123 = vst [vmem:[#allocation35_spill] sm:$0xff] %v4078_v10  ;;  %6125 = vst [vmem:[#allocation37_spill] sm:$0xff] %v4084_v32 }
  0xec   : > { %731 = vbcast.lane.b32.xlu1 %v725_v16, 264  ;;  %727 = vbcast.lane.b32.xlu0 %v725_v16, 256  ;;  %v758_v16 = vrot.slane %v127_v37, %v3815_v2  ;;  %v780_v2 = vrot.slane %v127_v37, %v3836_v9  ;;  %v802_v9 = vrot.slane %v127_v37, %v3844_v13 }
  0xee   : > { %v4100_v48 = vpop.permute.xlu0 %419 }
  0xef   : > { %6126 = vst [vmem:[#allocation38_spill] sm:$0xff] %v4100_v48  ;;  %v1240_v14 = vcombine.low %v4073_v35, %v4100_v48  ;;  %v813_v35 = vrot.slane %v127_v37, %v3848_v15 }
  0xf0   : > { %742 = vbcast.lane.b32.xlu1 %v736_v63, 264  ;;  %738 = vbcast.lane.b32.xlu0 %v736_v63, 256 }
  0xf1   : > { %v1248_v28 = vrot.slane %v1240_v14, %v3897_v57 }
  0xf2   : > { %v4107_v27 = vpop.permute.xlu0 %430 }
  0xf3   : > { %6128 = vst [vmem:[#allocation40_spill] sm:$0xff] %v4107_v27  ;;  %v1256_v62 = vcombine.low %v4078_v10, %v4107_v27 }
  0xf4   : > { %753 = vbcast.lane.b32.xlu1 %v747_v50, 264  ;;  %749 = vbcast.lane.b32.xlu0 %v747_v50, 256  ;;  %v4127_v50 = vpop.permute.xlu1 %401 }
  0xf5   : > { %v1264_v51 = vrot.slane %v1256_v62, %v3897_v57  ;;  %v791_v62 = vrot.slane %v127_v37, %v3840_v11  ;;  %6134 = vst [vmem:[#allocation46_spill] sm:$0xff] %v4127_v50 }
  0xf6   : > { %v4116_v3 = vpop.permute.xlu0 %441 }
  0xf7   : > { %6130 = vst [vmem:[#allocation42_spill] sm:$0xff] %v4116_v3  ;;  %v1305_v63 = vcombine.high %v1248_v28, %v1264_v51  ;;  %v1304_v19 = vcombine.low %v1248_v28, %v1264_v51 }
  0xf8   : > { %764 = vbcast.lane.b32.xlu1 %v758_v16, 264  ;;  %760 = vbcast.lane.b32.xlu0 %v758_v16, 256 }
  0xf9   : > { %v4144_v48 = vrot.slane %v1304_v19, %v3936_v29  ;;  %v4150_v51 = vrot.slane %v1305_v63, %v3936_v29  ;;  %v1233_v19 = vcombine.high %v4081_v24, %v4084_v32 }
  0xfa   : > { %v4119_v4 = vpop.permute.xlu0 %452 }
  0xfb   : > { %6131 = vst [vmem:[#allocation43_spill] sm:$0xff] %v4119_v4  ;;  %6137 = vst [vmem:[#allocation49_spill] sm:$0xff] %v4144_v48 }
  0xfc   : > { %775 = vbcast.lane.b32.xlu1 %v769_v54, 264  ;;  %771 = vbcast.lane.b32.xlu0 %v769_v54, 256 }
  0xfe   : > { %v4124_v26 = vpop.permute.xlu0 %463 }
  0xff   : > { %6133 = vst [vmem:[#allocation45_spill] sm:$0xff] %v4124_v26  ;;  %v1272_v7 = vcombine.low %v4116_v3, %v4124_v26 }
 0x100   : > { %786 = vbcast.lane.b32.xlu1 %v780_v2, 264  ;;  %782 = vbcast.lane.b32.xlu0 %v780_v2, 256  ;;  %v4140_v2 = vpop.permute.xlu1 %412 }
 0x101   : > { %v1280_v11 = vrot.slane %v1272_v7, %v3897_v57  ;;  %6136 = vst [vmem:[#allocation48_spill] sm:$0xff] %v4140_v2  ;;  %v824_v7 = vrot.slane %v127_v37, %v3852_v17  ;;  %v1097_v17 = vcombine.high %v4014_v47, %v4017_v31 }
 0x102   : > { %v4131_v14 = vpop.permute.xlu0 %474 }
 0x103   : > { %6135 = vst [vmem:[#allocation47_spill] sm:$0xff] %v4131_v14  ;;  %v1288_v16 = vcombine.low %v4119_v4, %v4131_v14 }
 0x104   : > { %797 = vbcast.lane.b32.xlu1 %v791_v62, 264  ;;  %793 = vbcast.lane.b32.xlu0 %v791_v62, 256 }
 0x105   : > { %v1296_v54 = vrot.slane %v1288_v16, %v3897_v57  ;;  %v4164_v16 = vpop.permute.xlu1 %423 }
 0x106   : > { %v4138_v49 = vpop.permute.xlu0 %485  ;;  %6139 = vst [vmem:[#allocation51_spill] sm:$0xff] %v4164_v16 }
 0x107   : > { %v1336_v50 = vcombine.low %v1280_v11, %v1296_v54  ;;  %v1337_v59 = vcombine.high %v1280_v11, %v1296_v54  ;;  %v961_v54 = vcombine.high %v3949_v1, %v3952_v39 }
 0x108   : > { %808 = vbcast.lane.b32.xlu1 %v802_v9, 264  ;;  %804 = vbcast.lane.b32.xlu0 %v802_v9, 256 }
 0x109   : > { %v4147_v13 = vrot.slane %v1336_v50, %v3936_v29  ;;  %v4153_v28 = vrot.slane %v1337_v59, %v3936_v29  ;;  %v4172_v37 = vpop.permute.xlu1 %434 }
 0x10a   : > { %v4155_v62 = vpop.permute.xlu0 %496  ;;  %6140 = vst [vmem:[#allocation52_spill] sm:$0xff] %v4172_v37 }
 0x10b   : > { %6138 = vst [vmem:[#allocation50_spill] sm:$0xff] %v4147_v13  ;;  %v1369_v15 = vcombine.high %v4144_v48, %v4147_v13 }
 0x10c   : > { %819 = vbcast.lane.b32.xlu1 %v813_v35, 264  ;;  %815 = vbcast.lane.b32.xlu0 %v813_v35, 256 }
 0x10d   : > { %v4191_v47 = vpop.permute.xlu1 %445 }
 0x10e   : > { %v4166_v63 = vpop.permute.xlu0 %507  ;;  %6141 = vst [vmem:[#allocation53_spill] sm:$0xff] %v4191_v47 }
 0x10f   : > { %v1376_v59 = vcombine.low %v4138_v49, %v4166_v63 }
 0x110   : > { %830 = vbcast.lane.b32.xlu1 %v824_v7, 264  ;;  %826 = vbcast.lane.b32.xlu0 %v824_v7, 256 }
 0x111   : > { %v1384_v11 = vrot.slane %v1376_v59, %v3897_v57  ;;  %v4196_v59 = vpop.permute.xlu1 %456 }
 0x112   : > { %v4174_v9 = vpop.permute.xlu0 %518  ;;  %6142 = vst [vmem:[#allocation54_spill] sm:$0xff] %v4196_v59 }
 0x113   : > { %v1392_v35 = vcombine.low %v4155_v62, %v4174_v9 }
 0x114   : > { %3018 = vrot.lane.b32.xlu1 %v1097_v17, %s3776_s13  ;;  %3016 = vrot.lane.b32.xlu0 %v961_v54, %s3776_s13 }
 0x115   : > { %v1400_v7 = vrot.slane %v1392_v35, %v3897_v57  ;;  %v4206_v32 = vpop.permute.xlu1 %467 }
 0x116   : > { %v4186_v50 = vpop.permute.xlu0 %529  ;;  %6143 = vst [vmem:[#allocation55_spill] sm:$0xff] %v4206_v32 }
 0x117   : > { %v1441_v31 = vcombine.high %v1384_v11, %v1400_v7 }
 0x118   : > { %3022 = vrot.lane.b32.xlu1 %v1369_v15, %s3776_s13  ;;  %3020 = vrot.lane.b32.xlu0 %v1233_v19, %s3776_s13  ;;  %v1440_v15 = vcombine.low %v1384_v11, %v1400_v7 }
 0x119   : > { %v4219_v37 = vrot.slane %v1441_v31, %v3936_v29  ;;  %v4224_v11 = vpop.permute.xlu1 %478 }
 0x11a   : > { %v4194_v17 = vpop.permute.xlu0 %540  ;;  %v4213_v47 = vrot.slane %v1440_v15, %v3936_v29  ;;  %6147 = vst [vmem:[#allocation59_spill] sm:$0xff] %v4224_v11 }
 0x11c   : > { %6145 = vst [vmem:[#allocation57_spill] sm:$0xff] %v4213_v47 }
 0x11e   : > { %v4198_v54 = vpop.permute.xlu0 %551 }
 0x11f   : > { %v1408_v35 = vcombine.low %v4186_v50, %v4198_v54 }
 0x121   : > { %v1416_v24 = vrot.slane %v1408_v35, %v3897_v57  ;;  %v4239_v35 = vpop.permute.xlu1 %489 }
 0x122   : > { %v4202_v13 = vpop.permute.xlu0 %562  ;;  %6150 = vst [vmem:[#allocation62_spill] sm:$0xff] %v4239_v35 }
 0x123   : > { %v1424_v48 = vcombine.low %v4194_v17, %v4202_v13 }
 0x125   : > { %v1432_v19 = vrot.slane %v1424_v48, %v3897_v57  ;;  %v4249_v16 = vpop.permute.xlu1 %500 }
 0x126   : > { %v4210_v39 = vpop.permute.xlu0 %573  ;;  %6152 = vst [vmem:[#allocation64_spill] sm:$0xff] %v4249_v16 }
 0x127   : > { %6144 = vst [vmem:[#allocation56_spill] sm:$0xff] %v4210_v39  ;;  %v1472_v1 = vcombine.low %v1416_v24, %v1432_v19  ;;  %v1473_v59 = vcombine.high %v1416_v24, %v1432_v19 }
 0x129   : > { %v4216_v2 = vrot.slane %v1472_v1, %v3936_v29  ;;  %v4222_v32 = vrot.slane %v1473_v59, %v3936_v29 }
 0x12a   : > { %v4226_v7 = vpop.permute.xlu0 %584 }
 0x12b   : > { %6146 = vst [vmem:[#allocation58_spill] sm:$0xff] %v4216_v2  ;;  %6148 = vst [vmem:[#allocation60_spill] sm:$0xff] %v4226_v7  ;;  %v1505_v48 = vcombine.high %v4213_v47, %v4216_v2  ;;  %v4255_v47 = vpop.permute.xlu1 %511 }
 0x12c   : > { %6155 = vst [vmem:[#allocation67_spill] sm:$0xff] %v4255_v47 }
 0x12d   : > { %3024 = vrot.lane.b32.xlu0 %v1505_v48, %s3776_s13 }
 0x12e   : > { %v4237_v59 = vpop.permute.xlu0 %595 }
 0x12f   : > { %6149 = vst [vmem:[#allocation61_spill] sm:$0xff] %v4237_v59  ;;  %v1512_v15 = vcombine.low %v4210_v39, %v4237_v59  ;;  %v4261_v59 = vpop.permute.xlu1 %522 }
 0x130   : > { %6157 = vst [vmem:[#allocation69_spill] sm:$0xff] %v4261_v59 }
 0x131   : > { %v1520_v11 = vrot.slane %v1512_v15, %v3897_v57 }
 0x132   : > { %v4243_v19 = vpop.permute.xlu0 %606 }
 0x133   : > { %6151 = vst [vmem:[#allocation63_spill] sm:$0xff] %v4243_v19  ;;  %v1528_v24 = vcombine.low %v4226_v7, %v4243_v19  ;;  %v4271_v10 = vpop.permute.xlu1 %533 }
 0x134   : > { %6159 = vst [vmem:[#allocation71_spill] sm:$0xff] %v4271_v10 }
 0x135   : > { %v1536_v1 = vrot.slane %v1528_v24, %v3897_v57 }
 0x136   : > { %v4251_v31 = vpop.permute.xlu0 %617 }
 0x137   : > { %6153 = vst [vmem:[#allocation65_spill] sm:$0xff] %v4251_v31  ;;  %v1577_v48 = vcombine.high %v1520_v11, %v1536_v1  ;;  %v1576_v15 = vcombine.low %v1520_v11, %v1536_v1 }
 0x13a   : > { %v4253_v2 = vpop.permute.xlu0 %628 }
 0x13b   : > { %6154 = vst [vmem:[#allocation66_spill] sm:$0xff] %v4253_v2 }
 0x13e   : > { %v4257_v35 = vpop.permute.xlu0 %639 }
 0x13f   : > { %6156 = vst [vmem:[#allocation68_spill] sm:$0xff] %v4257_v35  ;;  %v1544_v39 = vcombine.low %v4251_v31, %v4257_v35  ;;  %v4274_v31 = vrot.slane %v1576_v15, %v3936_v29  ;;  %v4280_v35 = vrot.slane %v1577_v48, %v3936_v29  ;;  %v4296_v48 = vpop.permute.xlu1 %544 }
 0x140   : > { %6162 = vst [vmem:[#allocation74_spill] sm:$0xff] %v4296_v48 }
 0x141   : > { %v1552_v16 = vrot.slane %v1544_v39, %v3897_v57  ;;  %6160 = vst [vmem:[#allocation72_spill] sm:$0xff] %v4274_v31 }
 0x142   : > { %v4263_v7 = vpop.permute.xlu0 %650 }
 0x143   : > { %6158 = vst [vmem:[#allocation70_spill] sm:$0xff] %v4263_v7  ;;  %v1560_v24 = vcombine.low %v4253_v2, %v4263_v7  ;;  %v4302_v15 = vpop.permute.xlu1 %555 }
 0x144   : > { %6163 = vst [vmem:[#allocation75_spill] sm:$0xff] %v4302_v15 }
 0x145   : > { %v1568_v19 = vrot.slane %v1560_v24, %v3897_v57 }
 0x146   : > { %v4269_v3 = vpop.permute.xlu0 %661 }
 0x147   : > { %v1608_v47 = vcombine.low %v1552_v16, %v1568_v19  ;;  %v1609_v26 = vcombine.high %v1552_v16, %v1568_v19  ;;  %v4306_v2 = vpop.permute.xlu1 %566 }
 0x148   : > { %6164 = vst [vmem:[#allocation76_spill] sm:$0xff] %v4306_v2 }
 0x149   : > { %v4277_v59 = vrot.slane %v1608_v47, %v3936_v29  ;;  %v4283_v11 = vrot.slane %v1609_v26, %v3936_v29 }
 0x14a   : > { %v4285_v39 = vpop.permute.xlu0 %672 }
 0x14b   : > { %6161 = vst [vmem:[#allocation73_spill] sm:$0xff] %v4277_v59  ;;  %v1641_v1 = vcombine.high %v4274_v31, %v4277_v59  ;;  %v4316_v59 = vpop.permute.xlu1 %577 }
 0x14c   : > { %6165 = vst [vmem:[#allocation77_spill] sm:$0xff] %v4316_v59 }
 0x14d   : > { %3026 = vrot.lane.b32.xlu1 %v1641_v1, %s3776_s13 }
 0x14e   : > { %v4298_v26 = vpop.permute.xlu0 %683 }
 0x14f   : > { %v1648_v1 = vcombine.low %v4269_v3, %v4298_v26  ;;  %v4328_v33 = vpop.permute.xlu1 %588 }
 0x150   : > { %6166 = vst [vmem:[#allocation78_spill] sm:$0xff] %v4328_v33 }
 0x151   : > { %v1656_v2 = vrot.slane %v1648_v1, %v3897_v57 }
 0x152   : > { %v4300_v24 = vpop.permute.xlu0 %694 }
 0x153   : > { %v1664_v19 = vcombine.low %v4285_v39, %v4300_v24  ;;  %v4342_v8 = vpop.permute.xlu1 %599 }
 0x154   : > { %6169 = vst [vmem:[#allocation81_spill] sm:$0xff] %v4342_v8  ;;  %v833_v8 = vcombine.high %v3882_v45, %v3893_v55 }
 0x155   : > { %v1672_v31 = vrot.slane %v1664_v19, %v3897_v57 }
 0x156   : > { %v4304_v10 = vpop.permute.xlu0 %705 }
 0x157   : > { %v1712_v27 = vcombine.low %v1656_v2, %v1672_v31  ;;  %v1713_v21 = vcombine.high %v1656_v2, %v1672_v31 }
 0x159   : > { %v4333_v53 = vrot.slane %v1712_v27, %v3936_v29  ;;  %v6170_v27 = vcombine.low %v3955_v40, %v3958_v41 }
 0x15a   : > { %v4308_v16 = vpop.permute.xlu0 %716 }
 0x15b   : > { %6167 = vst [vmem:[#allocation79_spill] sm:$0xff] %v4333_v53 }
 0x15e   : > { %v4312_v47 = vpop.permute.xlu0 %727 }
 0x15f   : > { %v1680_v48 = vcombine.low %v4304_v10, %v4312_v47 }
 0x161   : > { %v1688_v4 = vrot.slane %v1680_v48, %v3897_v57 }
 0x162   : > { %v4321_v15 = vpop.permute.xlu0 %738 }
 0x163   : > { %v1696_v7 = vcombine.low %v4308_v16, %v4321_v15 }
 0x165   : > { %v1704_v14 = vrot.slane %v1696_v7, %v3897_v57  ;;  %v6172_v7 = vcombine.low %v4087_v46, %v4090_v42 }
 0x166   : > { %v4330_v59 = vpop.permute.xlu0 %749 }
 0x167   : > { %v1744_v19 = vcombine.low %v1688_v4, %v1704_v14  ;;  %v1745_v23 = vcombine.high %v1688_v4, %v1704_v14 }
 0x169   : > { %v4336_v38 = vrot.slane %v1744_v19, %v3936_v29  ;;  %v4353_v19 = vpop.permute.xlu1 %610 }
 0x16a   : > { %v4338_v1 = vpop.permute.xlu0 %760  ;;  %6171 = vst [vmem:[#allocation82_spill] sm:$0xff] %v4353_v19  ;;  %v1727_v19 = vrot.slane %v1713_v21, %v3936_v29 }
 0x16b   : > { %6168 = vst [vmem:[#allocation80_spill] sm:$0xff] %v4336_v38  ;;  %v1777_v58 = vcombine.high %v4333_v53, %v4336_v38  ;;  %v1759_v38 = vrot.slane %v1745_v23, %v3936_v29  ;;  %v881_v23 = vcombine.high %v3917_v12, %v3929_v25 }
 0x16d   : > { %3028 = vrot.lane.b32.xlu0 %v1777_v58, %s3776_s13  ;;  %v4364_v53 = vpop.permute.xlu1 %621  ;;  %v1778_v14 = vcombine.low %v1727_v19, %v1759_v38 }
 0x16e   : > { %v4347_v48 = vpop.permute.xlu0 %771  ;;  %6173 = vst [vmem:[#allocation83_spill] sm:$0xff] %v4364_v53  ;;  %v865_v53 = vcombine.high %v3912_v5, %v3922_v20  ;;  %v1153_v5 = vcombine.high %v4054_v18, %v4064_v61  ;;  %v1137_v61 = vcombine.high %v4049_v43, %v4059_v36  ;;  %v1425_v36 = vcombine.high %v4194_v17, %v4202_v13 }
 0x16f   : > { %v1784_v21 = vcombine.low %v4330_v59, %v4347_v48 }
 0x171   : > { %3048 = vrot.lane.b32.xlu0 %v6170_v27, %s3777_s14  ;;  %v6174_v27 = vcombine.low %v4219_v37, %v4222_v32  ;;  %v4378_v31 = vpop.permute.xlu1 %632  ;;  %v4410_v55 = vrot.slane %v1784_v21, %v3897_v57 }
 0x172   : > { %v4355_v33 = vpop.permute.xlu0 %782  ;;  %6175 = vst [vmem:[#allocation84_spill] sm:$0xff] %v4378_v31 }
 0x173   : > { %v1800_v2 = vcombine.low %v4338_v1, %v4355_v33 }
 0x175   : > { %3052 = vrot.lane.b32.xlu0 %v6172_v7, %s3777_s14  ;;  %v4421_v18 = vpop.permute.xlu1 %643 }
 0x176   : > { %v4361_v58 = vpop.permute.xlu0 %793  ;;  %6177 = vst [vmem:[#allocation85_spill] sm:$0xff] %v4421_v18 }
 0x179   : > { %3056 = vrot.lane.b32.xlu0 %v6174_v27, %s3777_s14  ;;  %v849_v27 = vcombine.high %v3880_v44, %v3903_v60  ;;  %v6176_v44 = vcombine.high %v3955_v40, %v3958_v41  ;;  %v4400_v60 = vrot.slane %v881_v23, %v3897_v57  ;;  %v4415_v40 = vrot.slane %v865_v53, %v3897_v57 }
 0x17a   : > { %v4371_v4 = vpop.permute.xlu0 %804  ;;  %v1121_v41 = vcombine.high %v4011_v22, %v4042_v34  ;;  %v6178_v53 = vcombine.high %v4087_v46, %v4090_v42  ;;  %v1105_v22 = vcombine.high %v4008_v52, %v4035_v56  ;;  %v4449_v46 = vrot.slane %v1137_v61, %v3897_v57 }
 0x17b   : > { %v4407_v45 = vrot.slane %v849_v27, %v3897_v57  ;;  %v944_v43 = vcombine.low %v4415_v40, %v4400_v60  ;;  %v1393_v42 = vcombine.high %v4155_v62, %v4174_v9  ;;  %v1409_v52 = vcombine.high %v4186_v50, %v4198_v54  ;;  %v4472_v9 = vpop.permute.xlu1 %654 }
 0x17c   : > { %v6179_v56 = vcombine.high %v4219_v37, %v4222_v32  ;;  %v1377_v50 = vcombine.high %v4138_v49, %v4166_v63  ;;  %6182 = vst [vmem:[#allocation88_spill] sm:$0xff] %v4472_v9  ;;  %v4476_v37 = vrot.slane %v1425_v36, %v3897_v57  ;;  %v1697_v54 = vcombine.high %v4308_v16, %v4321_v15 }
 0x17d   : > { %3060 = vrot.lane.b32.xlu0 %v1778_v14, %s3777_s14  ;;  %v4391_v14 = vrot.slane %v1800_v2, %v3897_v57  ;;  %v4424_v2 = vrot.slane %v833_v8, %v3897_v57  ;;  %v4439_v8 = vrot.slane %v1153_v5, %v3897_v57  ;;  %v4466_v5 = vrot.slane %v1105_v22, %v3897_v57 }
 0x17e   : > { %v4380_v7 = vpop.permute.xlu0 %815  ;;  %v952_v32 = vrot.slane %v944_v43, %v3936_v29  ;;  %v4488_v49 = vrot.slane %v1409_v52, %v3897_v57  ;;  %v4501_v43 = vrot.slane %v1377_v50, %v3897_v57 }
 0x17f   : > { %v1816_v12 = vcombine.low %v4361_v58, %v4380_v7  ;;  %v1848_v23 = vcombine.low %v4410_v55, %v4391_v14  ;;  %v912_v34 = vcombine.low %v4424_v2, %v4407_v45  ;;  %v1216_v62 = vcombine.low %v4449_v46, %v4439_v8 }
 0x180   : > { %v1488_v22 = vcombine.low %v4488_v49, %v4476_v37 }
 0x181   : > { %3080 = vrot.lane.b32.xlu0 %v6176_v44, %s3778_s15  ;;  %v1824_v27 = vrot.slane %v1816_v12, %v3897_v57  ;;  %v4446_v44 = vrot.slane %v1121_v41, %v3897_v57  ;;  %v4460_v13 = vrot.slane %v1848_v23, %v3936_v29  ;;  %v4485_v23 = vrot.slane %v1393_v42, %v3897_v57 }
 0x182   : > { %v4404_v20 = vpop.permute.xlu0 %826  ;;  %v920_v63 = vrot.slane %v912_v34, %v3936_v29 }
 0x183   : > { %v1832_v25 = vcombine.low %v4371_v4, %v4404_v20  ;;  %6180 = vst [vmem:[#allocation86_spill] sm:$0xff] %v4460_v13  ;;  %v1184_v61 = vcombine.low %v4466_v5, %v4446_v44  ;;  %v1456_v34 = vcombine.low %v4501_v43, %v4485_v23 }
 0x184   : > { %v964_v15 = vcombine.low %v920_v63, %v952_v32 }
 0x185   : > { %v1840_v21 = vrot.slane %v1832_v25, %v3897_v57  ;;  %3084 = vrot.lane.b32.xlu0 %v6178_v53, %s3778_s15  ;;  %v1779_v25 = vcombine.high %v1727_v19, %v1759_v38  ;;  %v1665_v53 = vcombine.high %v4285_v39, %v4300_v24  ;;  %v1681_v38 = vcombine.high %v4304_v10, %v4312_v47  ;;  %v4510_v47 = vpop.permute.xlu1 %665 }
 0x186   : > { %v1224_v19 = vrot.slane %v1216_v62, %v3936_v29  ;;  %v1649_v39 = vcombine.high %v4269_v3, %v4298_v26  ;;  %v4508_v10 = vrot.slane %v1697_v54, %v3897_v57  ;;  %6183 = vst [vmem:[#allocation89_spill] sm:$0xff] %v4510_v47  ;;  %v1192_v24 = vrot.slane %v1184_v61, %v3936_v29 }
 0x187   : > { %v1880_v12 = vcombine.low %v1824_v27, %v1840_v21  ;;  %v4516_v36 = vrot.slane %v1665_v53, %v3897_v57  ;;  %v6184_v3 = vcombine.low %v4020_v0, %v4023_v6  ;;  %v1496_v62 = vrot.slane %v1488_v22, %v3936_v29 }
 0x188   : > { %v1236_v26 = vcombine.low %v1192_v24, %v1224_v19  ;;  %v4527_v42 = vrot.slane %v1649_v39, %v3897_v57  ;;  %v1849_v54 = vcombine.high %v4410_v55, %v4391_v14  ;;  %v6187_v14 = vcombine.low %v4280_v35, %v4283_v11 }
 0x189   : > { %3088 = vrot.lane.b32.xlu0 %v6179_v56, %s3778_s15  ;;  %v4463_v17 = vrot.slane %v1880_v12, %v3936_v29  ;;  %v4519_v12 = vrot.slane %v1681_v38, %v3897_v57  ;;  %v1881_v56 = vcombine.high %v1824_v27, %v1840_v21  ;;  %v4542_v61 = vpop.permute.xlu1 %676 }
 0x18a   : > { %v1728_v50 = vcombine.low %v4527_v42, %v4516_v36  ;;  %6186 = vst [vmem:[#allocation90_spill] sm:$0xff] %v4542_v61  ;;  %v1863_v38 = vrot.slane %v1849_v54, %v3936_v29 }
 0x18b   : > { %6181 = vst [vmem:[#allocation87_spill] sm:$0xff] %v4463_v17  ;;  %v1913_v41 = vcombine.high %v4460_v13, %v4463_v17  ;;  %v1760_v52 = vcombine.low %v4519_v12, %v4508_v10  ;;  %v4548_v53 = vrot.slane %v1881_v56, %v3936_v29 }
 0x18c   : > { %v1736_v55 = vrot.slane %v1728_v50, %v3936_v29  ;;  %v6192_v50 = vld [vmem:[#allocation18_spill] sm:$0xff] }
 0x18d   : > { %3092 = vrot.lane.b32.xlu0 %v1779_v25, %s3778_s15  ;;  %3030 = vrot.lane.b32.xlu1 %v1913_v41, %s3776_s13  ;;  %v6185_v25 = vcombine.low %v4150_v51, %v4153_v28  ;;  %v1464_v41 = vrot.slane %v1456_v34, %v3936_v29  ;;  %v4545_v21 = vrot.slane %v1760_v52, %v3936_v29  ;;  %v4559_v39 = vpop.permute.xlu1 %687  ;;  %v6189_v34 = vld [vmem:[#allocation22_spill] sm:$0xff]  ;;  %v6191_v52 = vld [vmem:[#allocation20_spill] sm:$0xff] }
 0x18e   : > { %v1914_v22 = vcombine.low %v1863_v38, %v4548_v53  ;;  %6188 = vst [vmem:[#allocation91_spill] sm:$0xff] %v4559_v39 }
 0x18f   : > { %v1508_v27 = vcombine.low %v1464_v41, %v1496_v62 }
 0x191   : > { %3112 = vrot.lane.b32.xlu0 %v964_v15, %s3779_s16  ;;  %3050 = vrot.lane.b32.xlu1 %v6184_v3, %s3777_s14  ;;  %v1780_v15 = vcombine.low %v1736_v55, %v4545_v21  ;;  %v1017_v3 = vcombine.high %v6189_v34, %v3999_v30  ;;  %v6194_v30 = vcombine.high %v4020_v0, %v4023_v6  ;;  %v6198_v34 = vld [vmem:[#allocation43_spill] sm:$0xff]  ;;  %v6200_v0 = vld [vmem:[#allocation40_spill] sm:$0xff] }
 0x192   : > { %v6201_v6 = vld [vmem:[#allocation35_spill] sm:$0xff] }
 0x193   : > { %v4572_v16 = vrot.slane %v1017_v3, %v3897_v57  ;;  %v1237_v3 = vcombine.high %v1192_v24, %v1224_v19  ;;  %v6205_v24 = vld [vmem:[#allocation38_spill] sm:$0xff] }
 0x195   : > { %3116 = vrot.lane.b32.xlu0 %v1236_v26, %s3779_s16  ;;  %3054 = vrot.lane.b32.xlu1 %v6185_v25, %s3777_s14  ;;  %v6190_v26 = vld [vmem:[#allocation23_spill] sm:$0xff]  ;;  %v965_v25 = vcombine.high %v920_v63, %v952_v32 }
 0x196   : > { %v1001_v56 = vcombine.high %v6191_v52, %v6190_v26  ;;  %v6197_v63 = vld [vmem:[#allocation47_spill] sm:$0xff]  ;;  %v4583_v52 = vpop.permute.xlu1 %698 }
 0x197   : > { %v1289_v26 = vcombine.high %v6198_v34, %v6197_v63  ;;  %6199 = vst [vmem:[#allocation22_spill] sm:$0xff] %v4583_v52  ;;  %v6207_v34 = vld [vmem:[#allocation70_spill] sm:$0xff] }
 0x199   : > { %3120 = vrot.lane.b32.xlu0 %v1508_v27, %s3779_s16  ;;  %3058 = vrot.lane.b32.xlu1 %v6187_v14, %s3777_s14  ;;  %v6193_v27 = vld [vmem:[#allocation13_spill] sm:$0xff]  ;;  %v945_v14 = vcombine.high %v4415_v40, %v4400_v60  ;;  %v913_v60 = vcombine.high %v4424_v2, %v4407_v45  ;;  %v4588_v40 = vrot.slane %v1001_v56, %v3897_v57 }
 0x19a   : > { %v985_v54 = vcombine.high %v6193_v27, %v6192_v50  ;;  %v1257_v50 = vcombine.high %v6201_v6, %v6200_v0  ;;  %v6202_v27 = vld [vmem:[#allocation45_spill] sm:$0xff]  ;;  %v6204_v45 = vcombine.high %v4150_v51, %v4153_v28  ;;  %v4613_v63 = vrot.slane %v1289_v26, %v3897_v57  ;;  %v6208_v0 = vld [vmem:[#allocation66_spill] sm:$0xff] }
 0x19b   : > { %v4605_v2 = vrot.slane %v945_v14, %v3936_v29  ;;  %v6206_v56 = vld [vmem:[#allocation33_spill] sm:$0xff]  ;;  %v1509_v6 = vcombine.high %v1464_v41, %v1496_v62  ;;  %v6214_v41 = vcombine.high %v4280_v35, %v4283_v11  ;;  %v1833_v11 = vcombine.high %v4371_v4, %v4404_v20 }
 0x19c   : > { %v4623_v28 = vrot.slane %v1257_v50, %v3897_v57  ;;  %v1801_v4 = vcombine.high %v4338_v1, %v4355_v33  ;;  %v1817_v20 = vcombine.high %v4361_v58, %v4380_v7  ;;  %v1785_v7 = vcombine.high %v4330_v59, %v4347_v48 }
 0x19d   : > { %3124 = vrot.lane.b32.xlu0 %v1780_v15, %s3779_s16  ;;  %3062 = vrot.lane.b32.xlu1 %v1914_v22, %s3777_s14  ;;  %v6195_v15 = vld [vmem:[#allocation17_spill] sm:$0xff]  ;;  %v6196_v22 = vld [vmem:[#allocation11_spill] sm:$0xff] }
 0x19e   : > { %v969_v32 = vcombine.high %v6196_v22, %v6195_v15  ;;  %v1080_v22 = vcombine.low %v4588_v40, %v4572_v16  ;;  %v4715_v59 = vrot.slane %v1817_v20, %v3897_v57  ;;  %v6221_v20 = vld [vmem:[#allocation8_spill] sm:$0xff] }
 0x1a0   : > { %v4608_v19 = vrot.slane %v969_v32, %v3897_v57  ;;  %v6209_v32 = vld [vmem:[#allocation63_spill] sm:$0xff]  ;;  %v4642_v50 = vrot.slane %v1080_v22, %v3936_v29  ;;  %v1781_v22 = vcombine.high %v1736_v55, %v4545_v21 }
 0x1a1   : > { %3144 = vrot.lane.b32.xlu0 %v965_v25, %s3780_s17  ;;  %3082 = vrot.lane.b32.xlu1 %v6194_v30, %s3778_s15  ;;  %v4591_v25 = vrot.slane %v985_v54, %v3897_v57  ;;  %v6203_v30 = vld [vmem:[#allocation42_spill] sm:$0xff]  ;;  %v1241_v54 = vcombine.high %v6206_v56, %v6205_v24  ;;  %v6212_v24 = vld [vmem:[#allocation68_spill] sm:$0xff]  ;;  %v6213_v56 = vld [vmem:[#allocation65_spill] sm:$0xff] }
 0x1a2   : > { %v1273_v15 = vcombine.high %v6203_v30, %v6202_v27  ;;  %v4618_v27 = vrot.slane %v913_v60, %v3936_v29  ;;  %v6210_v30 = vld [vmem:[#allocation60_spill] sm:$0xff]  ;;  %v1545_v62 = vcombine.high %v6213_v56, %v6212_v24  ;;  %v1915_v24 = vcombine.high %v1863_v38, %v4548_v53 }
 0x1a3   : > { %v1048_v51 = vcombine.low %v4608_v19, %v4591_v25  ;;  %v1529_v26 = vcombine.high %v6210_v30, %v6209_v32  ;;  %v6216_v32 = vld [vmem:[#allocation56_spill] sm:$0xff] }
 0x1a4   : > { %v4626_v14 = vrot.slane %v1273_v15, %v3897_v57  ;;  %v966_v60 = vcombine.low %v4618_v27, %v4605_v2  ;;  %v1217_v15 = vcombine.high %v4449_v46, %v4439_v8  ;;  %v1185_v8 = vcombine.high %v4466_v5, %v4446_v44 }
 0x1a5   : > { %3148 = vrot.lane.b32.xlu0 %v1237_v3, %s3780_s17  ;;  %3086 = vrot.lane.b32.xlu1 %v6204_v45, %s3778_s15  ;;  %v1561_v3 = vcombine.high %v6208_v0, %v6207_v34  ;;  %v4630_v45 = vpop.permute.xlu1 %709  ;;  %v4647_v34 = vrot.slane %v1241_v54, %v3897_v57  ;;  %v4665_v54 = vrot.slane %v1529_v26, %v3897_v57 }
 0x1a6   : > { %6211 = vst [vmem:[#allocation23_spill] sm:$0xff] %v4630_v45  ;;  %v1352_v0 = vcombine.low %v4626_v14, %v4613_v63  ;;  %v4668_v56 = vrot.slane %v1048_v51, %v3936_v29  ;;  %v1489_v44 = vcombine.high %v4488_v49, %v4476_v37  ;;  %v4686_v53 = vrot.slane %v1217_v15, %v3936_v29 }
 0x1a7   : > { %v4654_v35 = vrot.slane %v1561_v3, %v3897_v57  ;;  %v1320_v46 = vcombine.low %v4647_v34, %v4623_v28  ;;  %v4671_v3 = vrot.slane %v1545_v62, %v3897_v57  ;;  %v4699_v37 = vrot.slane %v1833_v11, %v3897_v57 }
 0x1a8   : > { %v1100_v21 = vcombine.low %v4668_v56, %v4642_v50  ;;  %v4689_v33 = vrot.slane %v1352_v0, %v3936_v29  ;;  %v1457_v49 = vcombine.high %v4501_v43, %v4485_v23  ;;  %v4704_v55 = vrot.slane %v1185_v8, %v3936_v29  ;;  %v6219_v8 = vld [vmem:[#allocation5_spill] sm:$0xff] }
 0x1a9   : > { %3152 = vrot.lane.b32.xlu0 %v1509_v6, %s3780_s17  ;;  %3090 = vrot.lane.b32.xlu1 %v6214_v41, %s3778_s15  ;;  %v6215_v6 = vld [vmem:[#allocation61_spill] sm:$0xff]  ;;  %v4681_v5 = vpop.permute.xlu1 %720  ;;  %v1624_v58 = vcombine.low %v4671_v3, %v4654_v35  ;;  %v4707_v38 = vrot.slane %v1320_v46, %v3936_v29  ;;  %v4712_v26 = vrot.slane %v1801_v4, %v3897_v57  ;;  %v6220_v46 = vld [vmem:[#allocation2_spill] sm:$0xff] }
 0x1aa   : > { %v1513_v30 = vcombine.high %v6216_v32, %v6215_v6  ;;  %6217 = vst [vmem:[#allocation20_spill] sm:$0xff] %v4681_v5  ;;  %v1238_v48 = vcombine.low %v4704_v55, %v4686_v53  ;;  %v4724_v43 = vrot.slane %v1489_v44, %v3936_v29  ;;  %v1761_v62 = vcombine.high %v4519_v12, %v4508_v10  ;;  %v6222_v44 = vld [vmem:[#allocation6_spill] sm:$0xff] }
 0x1ab   : > { %v1372_v23 = vcombine.low %v4707_v38, %v4689_v33  ;;  %v4729_v41 = vrot.slane %v1785_v7, %v3897_v57  ;;  %v4734_v15 = vrot.slane %v1624_v58, %v3936_v29  ;;  %v4739_v6 = vrot.slane %v1457_v49, %v3936_v29  ;;  %v6223_v58 = vld [vmem:[#allocation9_spill] sm:$0xff]  ;;  %v6224_v7 = vld [vmem:[#allocation7_spill] sm:$0xff] }
 0x1ac   : > { %v4692_v1 = vrot.slane %v1513_v30, %v3897_v57  ;;  %v1729_v32 = vcombine.high %v4527_v42, %v4516_v36  ;;  %v1936_v4 = vcombine.low %v6220_v46, %v6219_v8  ;;  %v1968_v49 = vcombine.low %v6224_v7, %v6223_v58  ;;  %v6231_v46 = vld [vmem:[#allocation30_spill] sm:$0xff] }
 0x1ad   : > { %3156 = vrot.lane.b32.xlu0 %v1781_v22, %s3780_s17  ;;  %3094 = vrot.lane.b32.xlu1 %v1915_v24, %s3778_s15  ;;  %v4736_v0 = vpop.permute.xlu1 %731  ;;  %v1864_v10 = vcombine.low %v4729_v41, %v4712_v26  ;;  %v1510_v30 = vcombine.low %v4739_v6, %v4724_v43  ;;  %v4752_v22 = vrot.slane %v1761_v62, %v3936_v29  ;;  %v6233_v7 = vld [vmem:[#allocation34_spill] sm:$0xff] }
 0x1ae   : > { %v1592_v51 = vcombine.low %v4692_v1, %v4665_v54  ;;  %6218 = vst [vmem:[#allocation18_spill] sm:$0xff] %v4736_v0  ;;  %v4760_v36 = vrot.slane %v1729_v32, %v3936_v29  ;;  %v967_v13 = vcombine.high %v4618_v27, %v4605_v2 }
 0x1af   : > { %v4763_v42 = vrot.slane %v1864_v10, %v3936_v29  ;;  %v4782_v10 = vrot.slane %v1936_v4, %v3897_v57  ;;  %v6230_v4 = vld [vmem:[#allocation32_spill] sm:$0xff] }
 0x1b0   : > { %v1600_v12 = vrot.slane %v1592_v51, %v3936_v29  ;;  %v2208_v8 = vcombine.low %v6231_v46, %v6230_v4  ;;  %v6244_v46 = vld [vmem:[#allocation74_spill] sm:$0xff] }
 0x1b1   : > { %3176 = vrot.lane.b32.xlu0 %v966_v60, %s3781_s18  ;;  %3114 = vrot.lane.b32.xlu1 %v1100_v21, %s3779_s16  ;;  %v1896_v60 = vcombine.low %v4715_v59, %v4699_v37  ;;  %v1952_v21 = vcombine.low %v6222_v44, %v6221_v20  ;;  %v4771_v51 = vpop.permute.xlu1 %742  ;;  %v6235_v44 = vld [vmem:[#allocation39_spill] sm:$0xff] }
 0x1b2   : > { %v1644_v11 = vcombine.low %v1600_v12, %v4734_v15  ;;  %6225 = vst [vmem:[#allocation13_spill] sm:$0xff] %v4771_v51 }
 0x1b3   : > { %v4755_v24 = vrot.slane %v1896_v60, %v3936_v29  ;;  %v1782_v60 = vcombine.low %v4760_v36, %v4752_v22 }
 0x1b5   : > { %3180 = vrot.lane.b32.xlu0 %v1238_v48, %s3781_s18  ;;  %3118 = vrot.lane.b32.xlu1 %v1372_v23, %s3779_s16  ;;  %v6226_v48 = vld [vmem:[#allocation4_spill] sm:$0xff]  ;;  %v6227_v23 = vld [vmem:[#allocation3_spill] sm:$0xff]  ;;  %v1916_v32 = vcombine.low %v4763_v42, %v4755_v24 }
 0x1b6   : > { %v1920_v62 = vcombine.low %v6227_v23, %v6226_v48  ;;  %v6228_v23 = vld [vmem:[#allocation31_spill] sm:$0xff] }
 0x1b8   : > { %v4791_v17 = vrot.slane %v1920_v62, %v3897_v57  ;;  %v4805_v62 = vpop.permute.xlu1 %753 }
 0x1b9   : > { %3184 = vrot.lane.b32.xlu0 %v1510_v30, %s3781_s18  ;;  %3122 = vrot.lane.b32.xlu1 %v1644_v11, %s3779_s16  ;;  %v4785_v30 = vrot.slane %v1952_v21, %v3897_v57  ;;  %v4788_v11 = vrot.slane %v1968_v49, %v3897_v57  ;;  %v6232_v21 = vld [vmem:[#allocation41_spill] sm:$0xff]  ;;  %v6234_v49 = vld [vmem:[#allocation44_spill] sm:$0xff]  ;;  %6236 = vst [vmem:[#allocation17_spill] sm:$0xff] %v4805_v62 }
 0x1ba   : > { %v2224_v58 = vcombine.low %v6233_v7, %v6232_v21  ;;  %v2240_v20 = vcombine.low %v6235_v44, %v6234_v49  ;;  %v1984_v2 = vcombine.low %v4791_v17, %v4782_v10  ;;  %v1239_v44 = vcombine.high %v4704_v55, %v4686_v53  ;;  %v6239_v21 = vld [vmem:[#allocation69_spill] sm:$0xff]  ;;  %v6240_v53 = vld [vmem:[#allocation64_spill] sm:$0xff] }
 0x1bb   : > { %v2016_v27 = vcombine.low %v4785_v30, %v4788_v11  ;;  %v4825_v49 = vrot.slane %v2208_v8, %v3897_v57  ;;  %v2480_v55 = vcombine.low %v6240_v53, %v6239_v21 }
 0x1bc   : > { %v4828_v7 = vrot.slane %v2224_v58, %v3897_v57  ;;  %v4843_v4 = vpop.permute.xlu1 %764 }
 0x1bd   : > { %3188 = vrot.lane.b32.xlu0 %v1782_v60, %s3781_s18  ;;  %3126 = vrot.lane.b32.xlu1 %v1916_v32, %s3779_s16  ;;  %v1101_v60 = vcombine.high %v4668_v56, %v4642_v50  ;;  %v6229_v32 = vld [vmem:[#allocation29_spill] sm:$0xff]  ;;  %v1049_v50 = vcombine.high %v4608_v19, %v4591_v25  ;;  %v1081_v56 = vcombine.high %v4588_v40, %v4572_v16  ;;  %v6237_v19 = vld [vmem:[#allocation67_spill] sm:$0xff]  ;;  %v6238_v16 = vld [vmem:[#allocation62_spill] sm:$0xff] }
 0x1be   : > { %v2192_v48 = vcombine.low %v6229_v32, %v6228_v23  ;;  %v4831_v25 = vrot.slane %v2240_v20, %v3897_v57  ;;  %v2464_v40 = vcombine.low %v6238_v16, %v6237_v19  ;;  %6245 = vst [vmem:[#allocation11_spill] sm:$0xff] %v4843_v4  ;;  %v1511_v20 = vcombine.high %v4739_v6, %v4724_v43 }
 0x1bf   : > { %v1645_v16 = vcombine.high %v1600_v12, %v4734_v15  ;;  %v4849_v19 = vrot.slane %v1984_v2, %v3936_v29  ;;  %v1353_v43 = vcombine.high %v4626_v14, %v4613_v63  ;;  %v4870_v6 = vrot.slane %v2480_v55, %v3897_v57 }
 0x1c0   : > { %v4867_v15 = vrot.slane %v2464_v40, %v3897_v57  ;;  %v2752_v63 = vcombine.low %v4542_v61, %v4583_v52  ;;  %v2768_v14 = vcombine.low %v4630_v45, %v4736_v0  ;;  %v1321_v40 = vcombine.high %v4647_v34, %v4623_v28  ;;  %v4894_v55 = vpop.permute.xlu1 %775  ;;  %v6256_v45 = vld [vmem:[#allocation21_spill] sm:$0xff] }
 0x1c1   : > { %3208 = vrot.lane.b32.xlu0 %v967_v13, %s3782_s19  ;;  %3146 = vrot.lane.b32.xlu1 %v1101_v60, %s3780_s17  ;;  %v1373_v13 = vcombine.high %v4707_v38, %v4689_v33  ;;  %v4822_v60 = vrot.slane %v2192_v48, %v3897_v57  ;;  %v6241_v33 = vld [vmem:[#allocation75_spill] sm:$0xff]  ;;  %v6243_v48 = vld [vmem:[#allocation76_spill] sm:$0xff]  ;;  %6246 = vst [vmem:[#allocation47_spill] sm:$0xff] %v4894_v55 }
 0x1c2   : > { %v6242_v38 = vld [vmem:[#allocation71_spill] sm:$0xff]  ;;  %v2512_v58 = vcombine.low %v6244_v46, %v6243_v48  ;;  %v4859_v46 = vrot.slane %v1049_v50, %v3936_v29  ;;  %v4862_v48 = vrot.slane %v1081_v56, %v3936_v29  ;;  %v2784_v50 = vcombine.low %v4681_v5, %v4771_v51  ;;  %v6254_v5 = vld [vmem:[#allocation12_spill] sm:$0xff] }
 0x1c3   : > { %v2496_v8 = vcombine.low %v6242_v38, %v6241_v33  ;;  %v2288_v38 = vcombine.low %v4828_v7, %v4831_v25  ;;  %v1783_v56 = vcombine.high %v4760_v36, %v4752_v22  ;;  %v2528_v28 = vcombine.low %v4867_v15, %v4870_v6  ;;  %v6267_v33 = vld [vmem:[#allocation59_spill] sm:$0xff] }
 0x1c4   : > { %v4878_v2 = vrot.slane %v2512_v58, %v3897_v57  ;;  %v1102_v58 = vcombine.low %v4859_v46, %v4862_v48  ;;  %v1625_v36 = vcombine.high %v4671_v3, %v4654_v35  ;;  %v1593_v35 = vcombine.high %v4692_v1, %v4665_v54  ;;  %v4934_v3 = vpop.permute.xlu0 %3016 }
 0x1c5   : > { %3212 = vrot.lane.b32.xlu0 %v1239_v44, %s3782_s19  ;;  %3150 = vrot.lane.b32.xlu1 %v1373_v13, %s3780_s17  ;;  %v4852_v44 = vrot.slane %v2016_v27, %v3936_v29  ;;  %v2256_v13 = vcombine.low %v4822_v60, %v4825_v49  ;;  %v4875_v12 = vrot.slane %v2496_v8, %v3897_v57 }
 0x1c6   : > { %v2736_v27 = vcombine.low %v4510_v47, %v4559_v39  ;;  %6247 = vst [vmem:[#allocation43_spill] sm:$0xff] %v4934_v3  ;;  %v6265_v47 = vld [vmem:[#allocation55_spill] sm:$0xff] }
 0x1c7   : > { %v2048_v8 = vcombine.low %v4849_v19, %v4852_v44  ;;  %v4903_v22 = vrot.slane %v2256_v13, %v3936_v29  ;;  %v2560_v34 = vcombine.low %v4875_v12, %v4878_v2  ;;  %v4921_v13 = vrot.slane %v2752_v63, %v3897_v57 }
 0x1c8   : > { %v4968_v3 = vpop.permute.xlu0 %3020 }
 0x1c9   : > { %3216 = vrot.lane.b32.xlu0 %v1511_v20, %s3782_s19  ;;  %3154 = vrot.lane.b32.xlu1 %v1645_v16, %s3780_s17  ;;  %v1917_v16 = vcombine.high %v4763_v42, %v4755_v24  ;;  %v4906_v24 = vrot.slane %v2288_v38, %v3936_v29  ;;  %v4915_v42 = vrot.slane %v1353_v43, %v3936_v29  ;;  %v4938_v43 = vpop.permute.xlu1 %786 }
 0x1ca   : > { %v4918_v20 = vrot.slane %v2736_v27, %v3897_v57  ;;  %v4924_v38 = vrot.slane %v2768_v14, %v3897_v57  ;;  %6248 = vst [vmem:[#allocation40_spill] sm:$0xff] %v4938_v43  ;;  %v4945_v14 = vrot.slane %v2528_v28, %v3936_v29  ;;  %v4948_v54 = vrot.slane %v2560_v34, %v3936_v29 }
 0x1cb   : > { %v2320_v27 = vcombine.low %v4903_v22, %v4906_v24  ;;  %v4964_v28 = vrot.slane %v1593_v35, %v3936_v29  ;;  %6249 = vst [vmem:[#allocation35_spill] sm:$0xff] %v4968_v3 }
 0x1cc   : > { %v2800_v1 = vcombine.low %v4918_v20, %v4921_v13  ;;  %v2592_v34 = vcombine.low %v4945_v14, %v4948_v54 }
 0x1cd   : > { %3220 = vrot.lane.b32.xlu0 %v1783_v56, %s3782_s19  ;;  %3158 = vrot.lane.b32.xlu1 %v1917_v16, %s3780_s17  ;;  %v4927_v56 = vrot.slane %v2784_v50, %v3897_v57  ;;  %v4930_v16 = vrot.slane %v1321_v40, %v3936_v29  ;;  %v1897_v40 = vcombine.high %v4715_v59, %v4699_v37 }
 0x1ce   : > { %v4973_v59 = vrot.slane %v2800_v1, %v3936_v29  ;;  %v6253_v1 = vld [vmem:[#allocation19_spill] sm:$0xff] }
 0x1cf   : > { %v1374_v63 = vcombine.low %v4930_v16, %v4915_v42  ;;  %v2832_v50 = vcombine.low %v4924_v38, %v4927_v56  ;;  %v2072_v51 = vcombine.low %v6254_v5, %v6253_v1 }
 0x1d1   : > { %3240 = vrot.lane.b32.xlu0 %v2048_v8, %s3783_s20  ;;  %3178 = vrot.lane.b32.xlu1 %v1102_v58, %s3781_s18  ;;  %v4957_v8 = vrot.slane %v1625_v36, %v3936_v29  ;;  %v1865_v58 = vcombine.high %v4729_v41, %v4712_v26  ;;  %v4976_v26 = vrot.slane %v2832_v50, %v3936_v29  ;;  %v4981_v36 = vpop.permute.xlu1 %797  ;;  %v6255_v50 = vld [vmem:[#allocation25_spill] sm:$0xff] }
 0x1d2   : > { %v4979_v41 = vrot.slane %v1897_v40, %v3936_v29  ;;  %6250 = vst [vmem:[#allocation45_spill] sm:$0xff] %v4981_v36  ;;  %v2088_v0 = vcombine.low %v6256_v45, %v6255_v50  ;;  %v4994_v40 = vpop.permute.xlu0 %3024  ;;  %v2049_v45 = vcombine.high %v4849_v19, %v4852_v44  ;;  %v6263_v44 = vld [vmem:[#allocation52_spill] sm:$0xff] }
 0x1d3   : > { %v1646_v37 = vcombine.low %v4964_v28, %v4957_v8  ;;  %v4986_v35 = vrot.slane %v1865_v58, %v3936_v29  ;;  %6257 = vst [vmem:[#allocation42_spill] sm:$0xff] %v4994_v40  ;;  %v2864_v61 = vcombine.low %v4973_v59, %v4976_v26  ;;  %v6259_v58 = vld [vmem:[#allocation24_spill] sm:$0xff]  ;;  %v5012_v40 = vrot.slane %v2072_v51, %v3897_v57  ;;  %v6266_v51 = vld [vmem:[#allocation53_spill] sm:$0xff] }
 0x1d4   : > { %v5015_v5 = vrot.slane %v2088_v0, %v3897_v57  ;;  %v2360_v39 = vcombine.low %v6266_v51, %v6265_v47  ;;  %v6268_v0 = vld [vmem:[#allocation54_spill] sm:$0xff]  ;;  %v2321_v51 = vcombine.high %v4903_v22, %v4906_v24  ;;  %v6270_v22 = vld [vmem:[#allocation81_spill] sm:$0xff] }
 0x1d5   : > { %3244 = vrot.lane.b32.xlu0 %v2320_v27, %s3783_s20  ;;  %3182 = vrot.lane.b32.xlu1 %v1374_v63, %s3781_s18  ;;  %v6251_v27 = vld [vmem:[#allocation16_spill] sm:$0xff]  ;;  %v6252_v63 = vld [vmem:[#allocation10_spill] sm:$0xff]  ;;  %v2376_v53 = vcombine.low %v6268_v0, %v6267_v33  ;;  %v1375_v0 = vcombine.high %v4930_v16, %v4915_v42  ;;  %v6271_v24 = vld [vmem:[#allocation77_spill] sm:$0xff] }
 0x1d6   : > { %v2056_v3 = vcombine.low %v6252_v63, %v6251_v27  ;;  %v5004_v63 = vpop.permute.xlu1 %808  ;;  %v2600_v42 = vcombine.low %v6271_v24, %v6270_v22  ;;  %v6272_v16 = vld [vmem:[#allocation82_spill] sm:$0xff]  ;;  %v2593_v24 = vcombine.high %v4945_v14, %v4948_v54  ;;  %v6292_v22 = vld [vmem:[#allocation39_spill] sm:$0xff] }
 0x1d7   : > { %6260 = vst [vmem:[#allocation38_spill] sm:$0xff] %v5004_v63  ;;  %v6273_v33 = vld [vmem:[#allocation78_spill] sm:$0xff] }
 0x1d8   : > { %v5009_v50 = vrot.slane %v2056_v3, %v3897_v57  ;;  %v6264_v3 = vld [vmem:[#allocation48_spill] sm:$0xff]  ;;  %v2616_v47 = vcombine.low %v6273_v33, %v6272_v16  ;;  %v1647_v33 = vcombine.high %v4964_v28, %v4957_v8  ;;  %v5099_v8 = vrot.slane %v2600_v42, %v3897_v57 }
 0x1d9   : > { %3248 = vrot.lane.b32.xlu0 %v2592_v34, %s3783_s20  ;;  %3186 = vrot.lane.b32.xlu1 %v1646_v37, %s3781_s18  ;;  %v1918_v34 = vcombine.low %v4986_v35, %v4979_v41  ;;  %v6258_v37 = vld [vmem:[#allocation28_spill] sm:$0xff]  ;;  %v2344_v27 = vcombine.low %v6264_v3, %v6263_v44 }
 0x1da   : > { %v2104_v52 = vcombine.low %v6259_v58, %v6258_v37  ;;  %v6261_v58 = vld [vmem:[#allocation51_spill] sm:$0xff]  ;;  %v6262_v37 = vld [vmem:[#allocation46_spill] sm:$0xff]  ;;  %v5102_v28 = vrot.slane %v2616_v47, %v3897_v57  ;;  %v2888_v47 = vcombine.low %v4843_v4, %v4938_v43  ;;  %v6291_v16 = vld [vmem:[#allocation44_spill] sm:$0xff] }
 0x1db   : > { %v2328_v19 = vcombine.low %v6262_v37, %v6261_v58  ;;  %v2241_v37 = vcombine.high %v6292_v22, %v6291_v16 }
 0x1dd   : > { %3252 = vrot.lane.b32.xlu0 %v2864_v61, %s3783_s20  ;;  %3190 = vrot.lane.b32.xlu1 %v1918_v34, %s3781_s18  ;;  %v1103_v61 = vcombine.high %v4859_v46, %v4862_v48  ;;  %v5022_v34 = vrot.slane %v2104_v52, %v3897_v57  ;;  %v1985_v52 = vcombine.high %v4791_v17, %v4782_v10 }
 0x1de   : > { %v2017_v46 = vcombine.high %v4785_v30, %v4788_v11  ;;  %v2120_v48 = vcombine.low %v5009_v50, %v5012_v40  ;;  %v5052_v17 = vrot.slane %v2344_v27, %v3897_v57  ;;  %v5055_v10 = vrot.slane %v2360_v39, %v3897_v57  ;;  %v5057_v30 = vpop.permute.xlu1 %819  ;;  %v6274_v27 = vld [vmem:[#allocation83_spill] sm:$0xff] }
 0x1df   : > { %v5017_v1 = vpop.permute.xlu0 %3028  ;;  %6269 = vst [vmem:[#allocation33_spill] sm:$0xff] %v5057_v30  ;;  %v5060_v11 = vrot.slane %v2376_v53, %v3897_v57  ;;  %v2648_v39 = vcombine.low %v4378_v31, %v4472_v9  ;;  %v5073_v44 = vrot.slane %v1985_v52, %v3936_v29  ;;  %v2257_v31 = vcombine.high %v4822_v60, %v4825_v49 }
 0x1e0   : > { %v2289_v52 = vcombine.high %v4828_v7, %v4831_v25  ;;  %v2872_v60 = vcombine.low %v4805_v62, %v4894_v55  ;;  %v6286_v62 = vld [vmem:[#allocation3_spill] sm:$0xff]  ;;  %v2153_v22 = vcombine.high %v5015_v5, %v5022_v34 }
 0x1e1   : > { %3272 = vrot.lane.b32.xlu0 %v2049_v45, %s3784_s21  ;;  %3210 = vrot.lane.b32.xlu1 %v1103_v61, %s3782_s19  ;;  %v2152_v45 = vcombine.low %v5015_v5, %v5022_v34  ;;  %v5049_v61 = vrot.slane %v2328_v19, %v3897_v57  ;;  %v2632_v19 = vcombine.low %v6274_v27, %v4421_v18  ;;  %v6290_v27 = vld [vmem:[#allocation34_spill] sm:$0xff] }
 0x1e2   : > { %v2424_v54 = vcombine.low %v5055_v10, %v5060_v11  ;;  %v5110_v49 = vrot.slane %v2648_v39, %v3897_v57  ;;  %v5114_v25 = vpop.permute.xlu1 %830 }
 0x1e3   : > { %v5040_v3 = vpop.permute.xlu0 %3048  ;;  %v2392_v9 = vcombine.low %v5049_v61, %v5052_v17  ;;  %v5094_v14 = vrot.slane %v2152_v45, %v3936_v29  ;;  %v5107_v7 = vrot.slane %v2632_v19, %v3897_v57  ;;  %6275 = vst [vmem:[#allocation70_spill] sm:$0xff] %v5114_v25  ;;  %v5138_v19 = vrot.slane %v2289_v52, %v3936_v29 }
 0x1e4   : > { %v5155_v52 = vrot.slane %v2872_v60, %v3897_v57 }
 0x1e5   : > { %3276 = vrot.lane.b32.xlu0 %v2321_v51, %s3784_s21  ;;  %3214 = vrot.lane.b32.xlu1 %v1375_v0, %s3782_s19  ;;  %v5082_v51 = vrot.slane %v2017_v46, %v3936_v29  ;;  %v5085_v0 = vrot.slane %v2120_v48, %v3936_v29  ;;  %v2865_v46 = vcombine.high %v4973_v59, %v4976_v26 }
 0x1e6   : > { %v2920_v48 = vcombine.low %v5004_v63, %v5114_v25  ;;  %v5133_v26 = vrot.slane %v2257_v31, %v3936_v29  ;;  %v5141_v39 = vrot.slane %v2392_v9, %v3936_v29  ;;  %v2561_v31 = vcombine.high %v4875_v12, %v4878_v2  ;;  %v5168_v12 = vpop.permute.xlu1 %3018 }
 0x1e7   : > { %v5075_v53 = vpop.permute.xlu0 %3052  ;;  %v2050_v42 = vcombine.low %v5073_v44, %v5082_v51  ;;  %v2184_v59 = vcombine.low %v5085_v0, %v5094_v14  ;;  %v5158_v9 = vrot.slane %v2888_v47, %v3897_v57  ;;  %6276 = vst [vmem:[#allocation66_spill] sm:$0xff] %v5168_v12 }
 0x1e8   : > { %v2322_v2 = vcombine.low %v5133_v26, %v5138_v19  ;;  %v2323_v34 = vcombine.high %v5133_v26, %v5138_v19 }
 0x1e9   : > { %3280 = vrot.lane.b32.xlu0 %v2593_v24, %s3784_s21  ;;  %3218 = vrot.lane.b32.xlu1 %v1647_v33, %s3782_s19  ;;  %v2904_v33 = vcombine.low %v4981_v36, %v5057_v30  ;;  %v1919_v24 = vcombine.high %v4986_v35, %v4979_v41  ;;  %v5144_v41 = vrot.slane %v2424_v54, %v3936_v29  ;;  %v6279_v36 = vld [vmem:[#allocation9_spill] sm:$0xff] }
 0x1ea   : > { %v2529_v35 = vcombine.high %v4867_v15, %v4870_v6  ;;  %v5164_v15 = vrot.slane %v2920_v48, %v3897_v57  ;;  %v2936_v63 = vcombine.low %v5155_v52, %v5158_v9  ;;  %v5208_v30 = vpop.permute.xlu1 %3022 }
 0x1eb   : > { %v5124_v45 = vpop.permute.xlu0 %3056  ;;  %v5161_v54 = vrot.slane %v2904_v33, %v3897_v57  ;;  %v2456_v60 = vcombine.low %v5141_v39, %v5144_v41  ;;  %v5180_v33 = vrot.slane %v2561_v31, %v3936_v29  ;;  %6281 = vst [vmem:[#allocation63_spill] sm:$0xff] %v5208_v30 }
 0x1ec   : > { %v5177_v47 = vrot.slane %v2529_v35, %v3936_v29 }
 0x1ed   : > { %3284 = vrot.lane.b32.xlu0 %v2865_v46, %s3784_s21  ;;  %3222 = vrot.lane.b32.xlu1 %v1919_v24, %s3782_s19  ;;  %v2664_v46 = vcombine.low %v5099_v8, %v5102_v28  ;;  %v2696_v24 = vcombine.low %v5107_v7, %v5110_v49  ;;  %v2968_v35 = vcombine.low %v5161_v54, %v5164_v15 }
 0x1ef   : > { %v5166_v6 = vpop.permute.xlu0 %3060  ;;  %v5183_v48 = vrot.slane %v2664_v46, %v3936_v29  ;;  %v5186_v12 = vrot.slane %v2696_v24, %v3936_v29  ;;  %v6277_v46 = vld [vmem:[#allocation8_spill] sm:$0xff]  ;;  %v6278_v24 = vld [vmem:[#allocation6_spill] sm:$0xff] }
 0x1f0   : > { %v1953_v25 = vcombine.high %v6278_v24, %v6277_v46  ;;  %v5219_v46 = vrot.slane %v2936_v63, %v3936_v29  ;;  %v6282_v24 = vld [vmem:[#allocation5_spill] sm:$0xff] }
 0x1f1   : > { %3304 = vrot.lane.b32.xlu0 %v2050_v42, %s3785_s22  ;;  %3242 = vrot.lane.b32.xlu1 %v2184_v59, %s3783_s20  ;;  %v2801_v42 = vcombine.high %v4918_v20, %v4921_v13  ;;  %v2833_v59 = vcombine.high %v4924_v38, %v4927_v56  ;;  %v6280_v20 = vld [vmem:[#allocation7_spill] sm:$0xff]  ;;  %v2594_v38 = vcombine.low %v5177_v47, %v5180_v33 }
 0x1f2   : > { %v1969_v13 = vcombine.high %v6280_v20, %v6279_v36  ;;  %v2728_v56 = vcombine.low %v5183_v48, %v5186_v12  ;;  %v5222_v36 = vrot.slane %v2968_v35, %v3936_v29  ;;  %v6283_v20 = vld [vmem:[#allocation2_spill] sm:$0xff]  ;;  %v5229_v43 = vrot.slane %v1953_v25, %v3897_v57 }
 0x1f3   : > { %v5196_v31 = vpop.permute.xlu0 %3080  ;;  %v1937_v30 = vcombine.high %v6283_v20, %v6282_v24  ;;  %v2193_v25 = vcombine.high %v6229_v32, %v6228_v23  ;;  %v6287_v24 = vld [vmem:[#allocation32_spill] sm:$0xff]  ;;  %v6288_v20 = vld [vmem:[#allocation30_spill] sm:$0xff] }
 0x1f5   : > { %3308 = vrot.lane.b32.xlu0 %v2322_v2, %s3785_s22  ;;  %3246 = vrot.lane.b32.xlu1 %v2456_v60, %s3783_s20  ;;  %v5213_v2 = vrot.slane %v2801_v42, %v3936_v29  ;;  %v5216_v60 = vrot.slane %v2833_v59, %v3936_v29  ;;  %v5232_v42 = vrot.slane %v1969_v13, %v3897_v57  ;;  %v5234_v59 = vpop.permute.xlu1 %3026 }
 0x1f6   : > { %6284 = vst [vmem:[#allocation60_spill] sm:$0xff] %v5234_v59  ;;  %v2209_v13 = vcombine.high %v6288_v20, %v6287_v24  ;;  %v6289_v59 = vld [vmem:[#allocation41_spill] sm:$0xff]  ;;  %v5255_v58 = vrot.slane %v1937_v30, %v3897_v57  ;;  %v2121_v30 = vcombine.high %v5009_v50, %v5012_v40  ;;  %v5275_v16 = vrot.slane %v2193_v25, %v3897_v57  ;;  %v6297_v24 = vld [vmem:[#allocation75_spill] sm:$0xff] }
 0x1f7   : > { %v5210_v4 = vpop.permute.xlu0 %3084  ;;  %v2866_v35 = vcombine.low %v5213_v2, %v5216_v60  ;;  %v2225_v18 = vcombine.high %v6290_v27, %v6289_v59  ;;  %v6298_v20 = vld [vmem:[#allocation71_spill] sm:$0xff] }
 0x1f8   : > { %v5278_v59 = vrot.slane %v2209_v13, %v3897_v57  ;;  %v2497_v13 = vcombine.high %v6298_v20, %v6297_v24  ;;  %v5314_v19 = vrot.slane %v2121_v30, %v3936_v29  ;;  %v2595_v30 = vcombine.high %v5177_v47, %v5180_v33  ;;  %v6302_v33 = vld [vmem:[#allocation91_spill] sm:$0xff]  ;;  %v6306_v20 = vld [vmem:[#allocation18_spill] sm:$0xff] }
 0x1f9   : > { %3312 = vrot.lane.b32.xlu0 %v2594_v38, %s3785_s22  ;;  %3250 = vrot.lane.b32.xlu1 %v2728_v56, %s3783_s20  ;;  %v3000_v38 = vcombine.low %v5219_v46, %v5222_v36  ;;  %v6285_v56 = vld [vmem:[#allocation4_spill] sm:$0xff] }
 0x1fa   : > { %v1921_v55 = vcombine.high %v6286_v62, %v6285_v56  ;;  %v2032_v62 = vcombine.low %v5229_v43, %v5232_v42  ;;  %v6296_v56 = vld [vmem:[#allocation64_spill] sm:$0xff]  ;;  %v2272_v26 = vcombine.low %v5275_v16, %v5278_v59 }
 0x1fb   : > { %v5236_v63 = vpop.permute.xlu0 %3088  ;;  %v2481_v25 = vcombine.high %v6296_v56, %v6239_v21  ;;  %v6305_v56 = vld [vmem:[#allocation90_spill] sm:$0xff] }
 0x1fc   : > { %v5268_v27 = vrot.slane %v1921_v55, %v3897_v57  ;;  %v5283_v55 = vrot.slane %v2225_v18, %v3897_v57  ;;  %v6294_v18 = vld [vmem:[#allocation67_spill] sm:$0xff]  ;;  %v5355_v47 = vrot.slane %v2272_v26, %v3936_v29 }
 0x1fd   : > { %3316 = vrot.lane.b32.xlu0 %v2866_v35, %s3785_s22  ;;  %3254 = vrot.lane.b32.xlu1 %v3000_v38, %s3783_s20  ;;  %v2051_v35 = vcombine.high %v5073_v44, %v5082_v51  ;;  %v2185_v38 = vcombine.high %v5085_v0, %v5094_v14  ;;  %v5286_v44 = vrot.slane %v2241_v37, %v3897_v57  ;;  %v6295_v14 = vld [vmem:[#allocation62_spill] sm:$0xff] }
 0x1fe   : > { %v2000_v5 = vcombine.low %v5268_v27, %v5255_v58  ;;  %v2457_v51 = vcombine.high %v5141_v39, %v5144_v41  ;;  %v5299_v0 = vrot.slane %v2032_v62, %v3936_v29  ;;  %v2465_v37 = vcombine.high %v6295_v14, %v6294_v18 }
 0x1ff   : > { %v5259_v23 = vpop.permute.xlu1 %3030  ;;  %v5261_v32 = vpop.permute.xlu0 %3092  ;;  %v5317_v39 = vrot.slane %v2153_v22, %v3936_v29  ;;  %v2304_v21 = vcombine.low %v5283_v55, %v5286_v44  ;;  %v2393_v41 = vcombine.high %v5049_v61, %v5052_v17  ;;  %v2425_v62 = vcombine.high %v5055_v10, %v5060_v11 }
 0x200   : > { %v2729_v22 = vcombine.high %v5183_v48, %v5186_v12  ;;  %v5337_v14 = vrot.slane %v2465_v37, %v3897_v57  ;;  %v5340_v61 = vrot.slane %v2481_v25, %v3897_v57  ;;  %v5343_v17 = vrot.slane %v2497_v13, %v3897_v57  ;;  %v6303_v48 = vld [vmem:[#allocation89_spill] sm:$0xff]  ;;  %v6304_v37 = vld [vmem:[#allocation22_spill] sm:$0xff]  ;;  %v6307_v13 = vld [vmem:[#allocation23_spill] sm:$0xff] }
 0x201   : > { %3336 = vrot.lane.b32.xlu0 %v2051_v35, %s3786_s23  ;;  %3274 = vrot.lane.b32.xlu1 %v2185_v38, %s3784_s21  ;;  %v6299_v35 = vld [vmem:[#allocation76_spill] sm:$0xff]  ;;  %v6300_v38 = vld [vmem:[#allocation74_spill] sm:$0xff]  ;;  %v2186_v12 = vcombine.low %v5314_v19, %v5317_v39  ;;  %v5362_v25 = vrot.slane %v2304_v21, %v3936_v29  ;;  %v5365_v24 = vrot.slane %v2393_v41, %v3936_v29 }
 0x202   : > { %v3001_v21 = vcombine.high %v5219_v46, %v5222_v36  ;;  %v2544_v41 = vcombine.low %v5337_v14, %v5340_v61 }
 0x203   : > { %v5290_v50 = vpop.permute.xlu1 %3050  ;;  %v5292_v40 = vpop.permute.xlu0 %3112 }
 0x204   : > { %6293 = vst [vmem:[#allocation68_spill] sm:$0xff] %v5290_v50  ;;  %v2513_v50 = vcombine.high %v6300_v38, %v6299_v35  ;;  %v2769_v35 = vcombine.high %v6307_v13, %v6306_v20  ;;  %v6308_v38 = vld [vmem:[#allocation13_spill] sm:$0xff]  ;;  %v2697_v20 = vcombine.high %v5107_v7, %v5110_v49 }
 0x205   : > { %3340 = vrot.lane.b32.xlu0 %v2323_v34, %s3786_s23  ;;  %3278 = vrot.lane.b32.xlu1 %v2457_v51, %s3784_s21  ;;  %v5334_v51 = vrot.slane %v2000_v5, %v3936_v29  ;;  %v2737_v5 = vcombine.high %v6303_v48, %v6302_v33  ;;  %v2867_v33 = vcombine.high %v5213_v2, %v5216_v60  ;;  %v6310_v2 = vld [vmem:[#allocation79_spill] sm:$0xff]  ;;  %v6311_v60 = vld [vmem:[#allocation80_spill] sm:$0xff] }
 0x206   : > { %v5346_v10 = vrot.slane %v2513_v50, %v3897_v57  ;;  %v2753_v50 = vcombine.high %v6305_v56, %v6304_v37  ;;  %v5384_v37 = vrot.slane %v2425_v62, %v3936_v29  ;;  %v2665_v56 = vcombine.high %v5099_v8, %v5102_v28 }
 0x207   : > { %v5325_v18 = vpop.permute.xlu1 %3054  ;;  %v5327_v34 = vpop.permute.xlu0 %3116  ;;  %v2052_v11 = vcombine.low %v5334_v51, %v5299_v0  ;;  %v6312_v46 = vcombine.low %v6310_v2, %v6311_v60  ;;  %v5398_v62 = vrot.slane %v2737_v5, %v3897_v57  ;;  %v5406_v28 = vrot.slane %v2769_v35, %v3897_v57 }
 0x208   : > { %6301 = vst [vmem:[#allocation65_spill] sm:$0xff] %v5325_v18  ;;  %v2576_v48 = vcombine.low %v5343_v17, %v5346_v10  ;;  %v5401_v13 = vrot.slane %v2753_v50, %v3897_v57  ;;  %v6314_v50 = vld [vmem:[#allocation14_spill] sm:$0xff]  ;;  %v2324_v35 = vcombine.low %v5355_v47, %v5362_v25  ;;  %v5432_v2 = vrot.slane %v2544_v41, %v3936_v29 }
 0x209   : > { %3344 = vrot.lane.b32.xlu0 %v2595_v30, %s3786_s23  ;;  %3282 = vrot.lane.b32.xlu1 %v2729_v22, %s3784_s21  ;;  %v6309_v30 = vld [vmem:[#allocation20_spill] sm:$0xff]  ;;  %v3495_v36 = vsel %vm3488_vm0, %v6312_v46, %v5017_v1  ;;  %v2937_v41 = vcombine.high %v5155_v52, %v5158_v9  ;;  %v6322_v52 = vld [vmem:[#allocation10_spill] sm:$0xff] }
 0x20a   : > { %v2785_v22 = vcombine.high %v6309_v30, %v6308_v38  ;;  %v3504_v8 = vsel %vm3497_vm1, %v3495_v36, %v5166_v6  ;;  %v6313_v38 = vld [vmem:[#allocation43_spill] sm:$0xff]  ;;  %v5435_v60 = vrot.slane %v2576_v48, %v3936_v29  ;;  %v2816_v46 = vcombine.low %v5398_v62, %v5401_v13 }
 0x20b   : > { %v5371_v26 = vpop.permute.xlu1 %3058  ;;  %v5373_v18 = vpop.permute.xlu0 %3120  ;;  %v3513_v7 = vsel %vm3506_vm2, %v3504_v8, %v5261_v32  ;;  %v6315_v30 = vld [vmem:[#allocation15_spill] sm:$0xff]  ;;  %v2969_v48 = vcombine.high %v5161_v54, %v5164_v15  ;;  %v6324_v54 = vld [vmem:[#allocation12_spill] sm:$0xff] }
 0x20c   : > { %v5409_v1 = vrot.slane %v2785_v22, %v3897_v57  ;;  %v2458_v22 = vcombine.low %v5365_v24, %v5384_v37 }
 0x20d   : > { %3348 = vrot.lane.b32.xlu0 %v2867_v33, %s3786_s23  ;;  %3286 = vrot.lane.b32.xlu1 %v3001_v21, %s3784_s21  ;;  %v6316_v33 = vcombine.low %v6314_v50, %v6315_v30 }
 0x20f   : > { %v5413_v49 = vpop.permute.xlu1 %3062  ;;  %v3125_v5 = vpop.permute.xlu0 %3124  ;;  %v3489_v6 = vsel %vm3488_vm0, %v6316_v33, %v6313_v38  ;;  %v6319_v38 = vld [vmem:[#allocation37_spill] sm:$0xff]  ;;  %v6321_v33 = vld [vmem:[#allocation16_spill] sm:$0xff] }
 0x210   : > { %v5421_v21 = vsel %vm3515_vm3, %v3513_v7, %v3125_v5  ;;  %v3498_v32 = vsel %vm3497_vm1, %v3489_v6, %v5040_v3  ;;  %v5442_v3 = vrot.slane %v2665_v56, %v3936_v29  ;;  %v6317_v56 = vld [vmem:[#allocation35_spill] sm:$0xff]  ;;  %v6318_v5 = vld [vmem:[#allocation36_spill] sm:$0xff]  ;;  %v2057_v9 = vcombine.high %v6322_v52, %v6321_v33  ;;  %v6329_v52 = vld [vmem:[#allocation25_spill] sm:$0xff] }
 0x211   : > { %3368 = vrot.lane.b32.xlu0 %v2052_v11, %s3787_s24  ;;  %3306 = vrot.lane.b32.xlu1 %v2186_v12, %s3785_s22  ;;  %v3507_v36 = vsel %vm3506_vm2, %v3498_v32, %v5196_v31  ;;  %v5445_v11 = vrot.slane %v2697_v20, %v3936_v29  ;;  %v2848_v12 = vcombine.low %v5406_v28, %v5409_v1  ;;  %v6323_v6 = vld [vmem:[#allocation19_spill] sm:$0xff] }
 0x212   : > { %v3516_v8 = vsel %vm3515_vm3, %v3507_v36, %v5292_v40  ;;  %v6320_v20 = vcombine.low %v6318_v5, %v6319_v38  ;;  %v2073_v15 = vcombine.high %v6324_v54, %v6323_v6  ;;  %v2596_v36 = vcombine.low %v5432_v2, %v5435_v60  ;;  %v6325_v38 = vld [vmem:[#allocation42_spill] sm:$0xff]  ;;  %v6330_v6 = vld [vmem:[#allocation21_spill] sm:$0xff] }
 0x213   : > { %v5455_v7 = vpop.permute.xlu1 %3082  ;;  %v3145_v31 = vpop.permute.xlu0 %3144  ;;  %v5493_v5 = vrot.slane %v2969_v48, %v3936_v29  ;;  %v2089_v54 = vcombine.high %v6330_v6, %v6329_v52  ;;  %v5512_v48 = vrot.slane %v2057_v9, %v3897_v57  ;;  %v6334_v52 = vld [vmem:[#allocation46_spill] sm:$0xff] }
 0x214   : > { %v3491_v50 = vsel %vm3488_vm0, %v6320_v20, %v6317_v56  ;;  %v5463_v30 = vsel %vm3524_vm4, %v3516_v8, %v3145_v31  ;;  %v2730_v8 = vcombine.low %v5442_v3, %v5445_v11  ;;  %v5480_v31 = vrot.slane %v2816_v46, %v3936_v29  ;;  %v6326_v20 = vld [vmem:[#allocation57_spill] sm:$0xff] }
 0x215   : > { %v3500_v40 = vsel %vm3497_vm1, %v3491_v50, %v5075_v53  ;;  %3372 = vrot.lane.b32.xlu0 %v2324_v35, %s3787_s24  ;;  %3310 = vrot.lane.b32.xlu1 %v2458_v22, %s3785_s22  ;;  %v5487_v22 = vrot.slane %v2848_v12, %v3936_v29  ;;  %v6327_v50 = vld [vmem:[#allocation58_spill] sm:$0xff]  ;;  %v6331_v12 = vld [vmem:[#allocation28_spill] sm:$0xff] }
 0x216   : > { %v3509_v32 = vsel %vm3506_vm2, %v3500_v40, %v5210_v4  ;;  %v5490_v4 = vrot.slane %v2937_v41, %v3936_v29  ;;  %v6328_v46 = vcombine.low %v6326_v20, %v6327_v50  ;;  %v6332_v40 = vld [vmem:[#allocation24_spill] sm:$0xff] }
 0x217   : > { %v3518_v56 = vsel %vm3515_vm3, %v3509_v32, %v5327_v34  ;;  %v5484_v53 = vpop.permute.xlu1 %3086  ;;  %v3149_v35 = vpop.permute.xlu0 %3148  ;;  %v2105_v32 = vcombine.high %v6332_v40, %v6331_v12  ;;  %v2187_v40 = vcombine.high %v5314_v19, %v5317_v39 }
 0x218   : > { %v3493_v33 = vsel %vm3488_vm0, %v6328_v46, %v6325_v38  ;;  %v5501_v34 = vsel %vm3524_vm4, %v3518_v56, %v3149_v35  ;;  %v5515_v38 = vrot.slane %v2073_v15, %v3897_v57  ;;  %v5531_v15 = vrot.slane %v2089_v54, %v3897_v57 }
 0x219   : > { %v3502_v41 = vsel %vm3497_vm1, %v3493_v33, %v5124_v45  ;;  %3376 = vrot.lane.b32.xlu0 %v2596_v36, %s3787_s24  ;;  %3314 = vrot.lane.b32.xlu1 %v2730_v8, %s3785_s22  ;;  %v2868_v45 = vcombine.low %v5480_v31, %v5487_v22  ;;  %v3002_v36 = vcombine.low %v5490_v4, %v5493_v5  ;;  %v6333_v33 = vld [vmem:[#allocation51_spill] sm:$0xff] }
 0x21a   : > { %v3511_v56 = vsel %vm3506_vm2, %v3502_v41, %v5236_v63  ;;  %v5534_v63 = vrot.slane %v2105_v32, %v3897_v57  ;;  %v2033_v8 = vcombine.high %v5229_v43, %v5232_v42  ;;  %v2136_v46 = vcombine.low %v5512_v48, %v5515_v38  ;;  %v6335_v41 = vld [vmem:[#allocation52_spill] sm:$0xff]  ;;  %v6338_v43 = vld [vmem:[#allocation53_spill] sm:$0xff] }
 0x21b   : > { %v3520_v35 = vsel %vm3515_vm3, %v3511_v56, %v5373_v18  ;;  %v5521_v20 = vpop.permute.xlu1 %3090  ;;  %v3153_v50 = vpop.permute.xlu0 %3152  ;;  %v2001_v18 = vcombine.high %v5268_v27, %v5255_v58  ;;  %v2329_v6 = vcombine.high %v6334_v52, %v6333_v33  ;;  %v2053_v32 = vcombine.high %v5334_v51, %v5299_v0  ;;  %v6336_v58 = vld [vmem:[#allocation48_spill] sm:$0xff]  ;;  %v6337_v56 = vld [vmem:[#allocation55_spill] sm:$0xff] }
 0x21c   : > { %v5528_v9 = vsel %vm3524_vm4, %v3520_v35, %v3153_v50  ;;  %v2345_v27 = vcombine.high %v6336_v58, %v6335_v41  ;;  %v2361_v42 = vcombine.high %v6338_v43, %v6337_v56  ;;  %v6339_v35 = vld [vmem:[#allocation59_spill] sm:$0xff]  ;;  %v6340_v50 = vld [vmem:[#allocation54_spill] sm:$0xff]  ;;  %v2168_v33 = vcombine.low %v5531_v15, %v5534_v63  ;;  %v6348_v56 = vld [vmem:[#allocation88_spill] sm:$0xff] }
 0x21d   : > { %3380 = vrot.lane.b32.xlu0 %v2868_v45, %s3787_s24  ;;  %3318 = vrot.lane.b32.xlu1 %v3002_v36, %s3785_s22  ;;  %v2377_v45 = vcombine.high %v6340_v50, %v6339_v35  ;;  %v2273_v0 = vcombine.high %v5275_v16, %v5278_v59  ;;  %v5569_v19 = vrot.slane %v2136_v46, %v3936_v29  ;;  %v6342_v46 = vld [vmem:[#allocation81_spill] sm:$0xff]  ;;  %v6347_v58 = vld [vmem:[#allocation83_spill] sm:$0xff]  ;;  %v6349_v43 = vld [vmem:[#allocation84_spill] sm:$0xff] }
 0x21e   : > { %v5572_v39 = vrot.slane %v2001_v18, %v3936_v29  ;;  %v5575_v51 = vrot.slane %v2033_v8, %v3936_v29  ;;  %v5580_v52 = vrot.slane %v2329_v6, %v3897_v57  ;;  %v2459_v16 = vcombine.high %v5365_v24, %v5384_v37  ;;  %v6343_v6 = vld [vmem:[#allocation77_spill] sm:$0xff]  ;;  %v6344_v24 = vld [vmem:[#allocation82_spill] sm:$0xff] }
 0x21f   : > { %v5546_v54 = vpop.permute.xlu1 %3094  ;;  %v3157_v12 = vpop.permute.xlu0 %3156  ;;  %v2325_v59 = vcombine.high %v5355_v47, %v5362_v25  ;;  %v5589_v18 = vrot.slane %v2345_v27, %v3897_v57  ;;  %v5592_v8 = vrot.slane %v2361_v42, %v3897_v57  ;;  %v6345_v37 = vld [vmem:[#allocation78_spill] sm:$0xff]  ;;  %v5608_v47 = vrot.slane %v2168_v33, %v3936_v29  ;;  %v6346_v25 = vld [vmem:[#allocation85_spill] sm:$0xff] }
 0x220   : > { %v5560_v36 = vsel %vm3524_vm4, %v5421_v21, %v3157_v12  ;;  %v2305_v21 = vcombine.high %v5283_v55, %v5286_v44  ;;  %v5595_v55 = vrot.slane %v2377_v45, %v3897_v57  ;;  %v2617_v41 = vcombine.high %v6345_v37, %v6344_v24  ;;  %v6352_v37 = vld [vmem:[#allocation40_spill] sm:$0xff] }
 0x221   : > { %3338 = vrot.lane.b32.xlu1 %v2187_v40, %s3786_s23  ;;  %3400 = vrot.lane.b32.xlu0 %v2053_v32, %s3788_s25  ;;  %6341 = vst [vmem:[#allocation61_spill] sm:$0xff] %v5592_v8  ;;  %v2601_v32 = vcombine.high %v6343_v6, %v6342_v46  ;;  %v2633_v27 = vcombine.high %v6347_v58, %v6346_v25  ;;  %v6351_v6 = vld [vmem:[#allocation17_spill] sm:$0xff] }
 0x222   : > { %v2731_v50 = vcombine.high %v5442_v3, %v5445_v11  ;;  %v2597_v45 = vcombine.high %v5432_v2, %v5435_v60  ;;  %v5623_v33 = vrot.slane %v2273_v0, %v3936_v29  ;;  %v5634_v3 = vrot.slane %v2305_v21, %v3936_v29  ;;  %v6350_v21 = vld [vmem:[#allocation47_spill] sm:$0xff]  ;;  %v6354_v58 = vld [vmem:[#allocation33_spill] sm:$0xff] }
 0x223   : > { %v5582_v12 = vpop.permute.xlu1 %3114  ;;  %v3177_v40 = vpop.permute.xlu0 %3176  ;;  %v5637_v2 = vrot.slane %v2601_v32, %v3897_v57  ;;  %v5640_v60 = vrot.slane %v2617_v41, %v3897_v57  ;;  %v2188_v11 = vcombine.low %v5569_v19, %v5608_v47  ;;  %v5647_v0 = vrot.slane %v2633_v27, %v3897_v57  ;;  %v6353_v41 = vld [vmem:[#allocation11_spill] sm:$0xff] }
 0x224   : > { %v5599_v44 = vsel %vm3533_vm5, %v5463_v30, %v3177_v40  ;;  %v2649_v30 = vcombine.high %v6349_v43, %v6348_v56  ;;  %v2054_v40 = vcombine.low %v5572_v39, %v5575_v51  ;;  %v2873_v32 = vcombine.high %v6351_v6, %v6350_v21  ;;  %v6355_v56 = vld [vmem:[#allocation45_spill] sm:$0xff] }
 0x225   : > { %3342 = vrot.lane.b32.xlu1 %v2459_v16, %s3786_s23  ;;  %3404 = vrot.lane.b32.xlu0 %v2325_v59, %s3788_s25  ;;  %v2408_v16 = vcombine.low %v5580_v52, %v5589_v18  ;;  %v2440_v59 = vcombine.low %v5592_v8, %v5595_v55  ;;  %v2869_v24 = vcombine.high %v5480_v31, %v5487_v22 }
 0x226   : > { %v2889_v25 = vcombine.high %v6353_v41, %v6352_v37  ;;  %v2905_v43 = vcombine.high %v6355_v56, %v6354_v58  ;;  %v2326_v6 = vcombine.low %v5623_v33, %v5634_v3  ;;  %v2545_v37 = vcombine.high %v5337_v14, %v5340_v61 }
 0x227   : > { %v5614_v42 = vpop.permute.xlu1 %3118  ;;  %v3181_v35 = vpop.permute.xlu0 %3180  ;;  %v5671_v31 = vrot.slane %v2408_v16, %v3936_v29  ;;  %v5674_v22 = vrot.slane %v2440_v59, %v3936_v29  ;;  %v2577_v41 = vcombine.high %v5343_v17, %v5346_v10  ;;  %v2680_v16 = vcombine.low %v5637_v2, %v5640_v60 }
 0x228   : > { %v5631_v46 = vsel %vm3533_vm5, %v5501_v34, %v3181_v35  ;;  %v5650_v34 = vrot.slane %v2649_v30, %v3897_v57  ;;  %v6356_v35 = vld [vmem:[#allocation70_spill] sm:$0xff]  ;;  %v3003_v30 = vcombine.high %v5490_v4, %v5493_v5  ;;  %v6359_v5 = vld [vmem:[#allocation87_spill] sm:$0xff]  ;;  %v5694_v14 = vrot.slane %v2873_v32, %v3897_v57 }
 0x229   : > { %3346 = vrot.lane.b32.xlu1 %v2731_v50, %s3786_s23  ;;  %3408 = vrot.lane.b32.xlu0 %v2597_v45, %s3788_s25  ;;  %v6357_v50 = vld [vmem:[#allocation38_spill] sm:$0xff]  ;;  %v5699_v17 = vrot.slane %v2889_v25, %v3897_v57 }
 0x22a   : > { %v2921_v45 = vcombine.high %v6357_v50, %v6356_v35  ;;  %v6358_v4 = vld [vmem:[#allocation86_spill] sm:$0xff]  ;;  %v2712_v59 = vcombine.low %v5647_v0, %v5650_v34  ;;  %v6363_v50 = vld [vmem:[#allocation27_spill] sm:$0xff] }
 0x22b   : > { %v5662_v27 = vpop.permute.xlu1 %3122  ;;  %v3185_v8 = vpop.permute.xlu0 %3184  ;;  %v6361_v35 = vld [vmem:[#allocation66_spill] sm:$0xff] }
 0x22c   : > { %v5668_v21 = vsel %vm3533_vm5, %v5528_v9, %v3185_v8  ;;  %v6360_v9 = vcombine.low %v6358_v4, %v6359_v5  ;;  %v5705_v10 = vrot.slane %v2921_v45, %v3897_v57  ;;  %v6362_v32 = vld [vmem:[#allocation26_spill] sm:$0xff]  ;;  %v6365_v45 = vld [vmem:[#allocation68_spill] sm:$0xff]  ;;  %v5727_v5 = vrot.slane %v2577_v41, %v3936_v29 }
 0x22d   : > { %3350 = vrot.lane.b32.xlu1 %v3003_v30, %s3786_s23  ;;  %3412 = vrot.lane.b32.xlu0 %v2869_v24, %s3788_s25  ;;  %v6364_v30 = vcombine.low %v6362_v32, %v6363_v50 }
 0x22e   : > { %v3496_v8 = vsel %vm3488_vm0, %v6360_v9, %v5259_v23  ;;  %v5702_v23 = vrot.slane %v2905_v43, %v3897_v57  ;;  %v2460_v57 = vcombine.low %v5671_v31, %v5674_v22 }
 0x22f   : > { %v3505_v61 = vsel %vm3497_vm1, %v3496_v8, %v5413_v49  ;;  %v3127_v58 = vpop.permute.xlu1 %3126  ;;  %v3189_v56 = vpop.permute.xlu0 %3188  ;;  %v3490_v49 = vsel %vm3488_vm0, %v6364_v30, %v6361_v35  ;;  %v5734_v8 = vrot.slane %v2680_v16, %v3936_v29  ;;  %v6367_v16 = vld [vmem:[#allocation49_spill] sm:$0xff] }
 0x230   : > { %v3514_v24 = vsel %vm3506_vm2, %v3505_v61, %v5546_v54  ;;  %v3540_v43 = vsel %vm3533_vm5, %v5560_v36, %v3189_v56  ;;  %v3499_v4 = vsel %vm3497_vm1, %v3490_v49, %v6365_v45  ;;  %v5724_v54 = vrot.slane %v2545_v37, %v3936_v29  ;;  %v6366_v61 = vld [vmem:[#allocation63_spill] sm:$0xff] }
 0x231   : > { %v3523_v25 = vsel %vm3515_vm3, %v3514_v24, %v3127_v58  ;;  %3370 = vrot.lane.b32.xlu1 %v2188_v11, %s3787_s24  ;;  %3432 = vrot.lane.b32.xlu0 %v2054_v40, %s3789_s26  ;;  %v2817_v36 = vcombine.high %v5398_v62, %v5401_v13  ;;  %v3508_v9 = vsel %vm3506_vm2, %v3499_v4, %v5455_v7  ;;  %v6368_v24 = vld [vmem:[#allocation50_spill] sm:$0xff] }
 0x232   : > { %v5737_v11 = vrot.slane %v2712_v59, %v3936_v29  ;;  %v2849_v40 = vcombine.high %v5406_v28, %v5409_v1  ;;  %v2952_v37 = vcombine.low %v5694_v14, %v5699_v17  ;;  %v2984_v41 = vcombine.low %v5702_v23, %v5705_v10  ;;  %v6370_v1 = vld [vmem:[#allocation65_spill] sm:$0xff] }
 0x233   : > { %v3517_v62 = vsel %vm3515_vm3, %v3508_v9, %v5582_v12  ;;  %v3147_v13 = vpop.permute.xlu1 %3146  ;;  %v3209_v7 = vpop.permute.xlu0 %3208  ;;  %v6369_v58 = vcombine.low %v6367_v16, %v6368_v24  ;;  %v2598_v50 = vcombine.low %v5724_v54, %v5727_v5  ;;  %v2831_v30 = vrot.slane %v2817_v36, %v3936_v29  ;;  %v6372_v9 = vld [vmem:[#allocation72_spill] sm:$0xff] }
 0x234   : > { %v3526_v56 = vsel %vm3524_vm4, %v3517_v62, %v3147_v13  ;;  %v3543_v28 = vsel %vm3542_vm6, %v5599_v44, %v3209_v7  ;;  %v2732_v32 = vcombine.low %v5734_v8, %v5737_v11  ;;  %v2863_v4 = vrot.slane %v2849_v40, %v3936_v29  ;;  %v6373_v62 = vld [vmem:[#allocation73_spill] sm:$0xff] }
 0x235   : > { %v3492_v59 = vsel %vm3488_vm0, %v6369_v58, %v6366_v61  ;;  %3374 = vrot.lane.b32.xlu1 %v2460_v57, %s3787_s24  ;;  %3436 = vrot.lane.b32.xlu0 %v2326_v6, %s3789_s26  ;;  %v2960_v57 = vrot.slane %v2952_v37, %v3936_v29  ;;  %v2992_v6 = vrot.slane %v2984_v41, %v3936_v29 }
 0x236   : > { %v3501_v35 = vsel %vm3497_vm1, %v3492_v59, %v6370_v1  ;;  %v6374_v13 = vcombine.low %v6372_v9, %v6373_v62  ;;  %v2870_v58 = vcombine.low %v2831_v30, %v2863_v4  ;;  %v2953_v62 = vcombine.high %v5694_v14, %v5699_v17 }
 0x237   : > { %v3510_v12 = vsel %vm3506_vm2, %v3501_v35, %v5484_v53  ;;  %v3151_v49 = vpop.permute.xlu1 %3150  ;;  %v3213_v45 = vpop.permute.xlu0 %3212  ;;  %v6371_v53 = vld [vmem:[#allocation60_spill] sm:$0xff]  ;;  %v3004_v24 = vcombine.low %v2960_v57, %v2992_v6 }
 0x238   : > { %v3519_v44 = vsel %vm3515_vm3, %v3510_v12, %v5614_v42  ;;  %v3494_v7 = vsel %vm3488_vm0, %v6374_v13, %v6371_v53  ;;  %v3545_v36 = vsel %vm3542_vm6, %v5631_v46, %v3213_v45  ;;  %v2967_v14 = vrot.slane %v2953_v62, %v3936_v29 }
 0x239   : > { %v3528_v61 = vsel %vm3524_vm4, %v3519_v44, %v3151_v49  ;;  %v3503_v42 = vsel %vm3497_vm1, %v3494_v7, %v5371_v26  ;;  %3378 = vrot.lane.b32.xlu1 %v2732_v32, %s3787_s24  ;;  %3440 = vrot.lane.b32.xlu0 %v2598_v50, %s3789_s26  ;;  %v2461_v50 = vcombine.high %v5671_v31, %v5674_v22  ;;  %vm3664_vm0 = vcmask 523264  }
 0x23a   : > { %v3512_v40 = vsel %vm3506_vm2, %v3503_v42, %v5521_v20  ;;  %v2189_v20 = vcombine.high %v5569_v19, %v5608_v47  ;;  %v2327_v19 = vcombine.high %v5623_v33, %v5634_v3  ;;  %v2137_v47 = vcombine.high %v5512_v48, %v5515_v38  ;;  %v6375_v38 = vld [vmem:[#allocation61_spill] sm:$0xff] }
 0x23b   : > { %v3521_v37 = vsel %vm3515_vm3, %v3512_v40, %v5662_v27  ;;  %v3155_v41 = vpop.permute.xlu1 %3154  ;;  %v3217_v16 = vpop.permute.xlu0 %3216  ;;  %v2055_v27 = vcombine.high %v5572_v39, %v5575_v51  ;;  %v2733_v31 = vcombine.high %v5734_v8, %v5737_v11  ;;  %v2599_v33 = vcombine.high %v5724_v54, %v5727_v5 }
 0x23c   : > { %v3530_v59 = vsel %vm3524_vm4, %v3521_v37, %v3155_v41  ;;  %v3547_v46 = vsel %vm3542_vm6, %v5668_v21, %v3217_v16  ;;  %v2409_v48 = vcombine.high %v5580_v52, %v5589_v18  ;;  %v3005_v8 = vcombine.high %v2960_v57, %v2992_v6 }
 0x23d   : > { %3382 = vrot.lane.b32.xlu1 %v3004_v24, %s3787_s24  ;;  %3444 = vrot.lane.b32.xlu0 %v2870_v58, %s3789_s26  ;;  %v2871_v11 = vcombine.high %v2831_v30, %v2863_v4  ;;  %v2151_v54 = vrot.slane %v2137_v47, %v3936_v29  ;;  %v2713_v30 = vcombine.high %v5647_v0, %v5650_v34 }
 0x23e   : > { %v2423_v52 = vrot.slane %v2409_v48, %v3936_v29 }
 0x23f   : > { %v3159_v26 = vpop.permute.xlu1 %3158  ;;  %v3221_v1 = vpop.permute.xlu0 %3220  ;;  %v2727_v34 = vrot.slane %v2713_v30, %v3936_v29 }
 0x240   : > { %v3532_v35 = vsel %vm3524_vm4, %v3523_v25, %v3159_v26  ;;  %v3549_v12 = vsel %vm3542_vm6, %v3540_v43, %v3221_v1  ;;  %v2169_v25 = vcombine.high %v5531_v15, %v5534_v63  ;;  %v2441_v15 = vcombine.high %v6375_v38, %v5595_v55 }
 0x241   : > { %3402 = vrot.lane.b32.xlu1 %v2189_v20, %s3788_s25  ;;  %3464 = vrot.lane.b32.xlu0 %v2055_v27, %s3790_s27  ;;  %v2681_v55 = vcombine.high %v5637_v2, %v5640_v60  ;;  %v2985_v2 = vcombine.high %v5702_v23, %v5705_v10 }
 0x242   : > { %v2183_v5 = vrot.slane %v2169_v25, %v3936_v29  ;;  %v2455_v18 = vrot.slane %v2441_v15, %v3936_v29 }
 0x243   : > { %v3179_v21 = vpop.permute.xlu1 %3178  ;;  %v3241_v32 = vpop.permute.xlu0 %3240  ;;  %v2695_v0 = vrot.slane %v2681_v55, %v3936_v29  ;;  %v2999_v17 = vrot.slane %v2985_v2, %v3936_v29 }
 0x244   : > { %v3535_v39 = vsel %vm3533_vm5, %v3526_v56, %v3179_v21  ;;  %v3552_v51 = vsel %vm3551_vm7, %v3543_v28, %v3241_v32  ;;  %v2190_v6 = vcombine.low %v2151_v54, %v2183_v5  ;;  %v2462_v9 = vcombine.low %v2423_v52, %v2455_v18 }
 0x245   : > { %3406 = vrot.lane.b32.xlu1 %v2461_v50, %s3788_s25  ;;  %3468 = vrot.lane.b32.xlu0 %v2327_v19, %s3790_s27  ;;  %v2734_v40 = vcombine.low %v2695_v0, %v2727_v34  ;;  %v3006_v16 = vcombine.low %v2967_v14, %v2999_v17  ;;  %v2191_v26 = vcombine.high %v2151_v54, %v2183_v5 }
 0x246   : > { %v2735_v19 = vcombine.high %v2695_v0, %v2727_v34 }
 0x247   : > { %v3183_v43 = vpop.permute.xlu1 %3182  ;;  %v3245_v44 = vpop.permute.xlu0 %3244 }
 0x248   : > { %v3537_v3 = vsel %vm3533_vm5, %v3528_v61, %v3183_v43  ;;  %v3554_v22 = vsel %vm3551_vm7, %v3545_v36, %v3245_v44  ;;  %v3007_v43 = vcombine.high %v2967_v14, %v2999_v17 }
 0x249   : > { %3410 = vrot.lane.b32.xlu1 %v2733_v31, %s3788_s25  ;;  %3472 = vrot.lane.b32.xlu0 %v2599_v33, %s3790_s27 }
 0x24b   : > { %v3187_v63 = vpop.permute.xlu1 %3186  ;;  %v3249_v56 = vpop.permute.xlu0 %3248 }
 0x24c   : > { %v3539_v28 = vsel %vm3533_vm5, %v3530_v59, %v3187_v63  ;;  %v3556_v49 = vsel %vm3551_vm7, %v3547_v46, %v3249_v56 }
 0x24d   : > { %3414 = vrot.lane.b32.xlu1 %v3005_v8, %s3788_s25  ;;  %3476 = vrot.lane.b32.xlu0 %v2871_v11, %s3790_s27 }
 0x24f   : > { %v3191_v45 = vpop.permute.xlu1 %3190  ;;  %v3253_v57 = vpop.permute.xlu0 %3252 }
 0x250   : > { %v3541_v4 = vsel %vm3533_vm5, %v3532_v35, %v3191_v45  ;;  %v3558_v53 = vsel %vm3551_vm7, %v3549_v12, %v3253_v57  ;;  %v2463_v35 = vcombine.high %v2423_v52, %v2455_v18 }
 0x251   : > { %3434 = vrot.lane.b32.xlu1 %v2190_v6, %s3789_s26 }
 0x253   : > { %v3211_v60 = vpop.permute.xlu1 %3210  ;;  %v3273_v13 = vpop.permute.xlu0 %3272 }
 0x254   : > { %v3544_v7 = vsel %vm3542_vm6, %v3535_v39, %v3211_v60  ;;  %v3561_v61 = vsel %vm3560_vm8, %v3552_v51, %v3273_v13 }
 0x255   : > { %3438 = vrot.lane.b32.xlu1 %v2462_v9, %s3789_s26 }
 0x257   : > { %v3215_v36 = vpop.permute.xlu1 %3214  ;;  %v3277_v42 = vpop.permute.xlu0 %3276 }
 0x258   : > { %v3546_v23 = vsel %vm3542_vm6, %v3537_v3, %v3215_v36  ;;  %v3563_v10 = vsel %vm3560_vm8, %v3554_v22, %v3277_v42 }
 0x259   : > { %3442 = vrot.lane.b32.xlu1 %v2734_v40, %s3789_s26 }
 0x25b   : > { %v3219_v37 = vpop.permute.xlu1 %3218  ;;  %v3281_v41 = vpop.permute.xlu0 %3280 }
 0x25c   : > { %v3548_v24 = vsel %vm3542_vm6, %v3539_v28, %v3219_v37  ;;  %v3565_v58 = vsel %vm3560_vm8, %v3556_v49, %v3281_v41 }
 0x25d   : > { %3446 = vrot.lane.b32.xlu1 %v3006_v16, %s3789_s26 }
 0x25f   : > { %v3223_v59 = vpop.permute.xlu1 %3222  ;;  %v3285_v46 = vpop.permute.xlu0 %3284 }
 0x260   : > { %v3550_v29 = vsel %vm3542_vm6, %v3541_v4, %v3223_v59  ;;  %v3567_v1 = vsel %vm3560_vm8, %v3558_v53, %v3285_v46 }
 0x261   : > { %3466 = vrot.lane.b32.xlu1 %v2191_v26, %s3790_s27 }
 0x263   : > { %v3243_v20 = vpop.permute.xlu1 %3242  ;;  %v3305_v27 = vpop.permute.xlu0 %3304 }
 0x264   : > { %v3553_v12 = vsel %vm3551_vm7, %v3544_v7, %v3243_v20  ;;  %v3570_v21 = vsel %vm3569_vm9, %v3561_v61, %v3305_v27 }
 0x265   : > { %3470 = vrot.lane.b32.xlu1 %v2463_v35, %s3790_s27 }
 0x267   : > { %v3247_v32 = vpop.permute.xlu1 %3246  ;;  %v3309_v50 = vpop.permute.xlu0 %3308 }
 0x268   : > { %v3555_v39 = vsel %vm3551_vm7, %v3546_v23, %v3247_v32  ;;  %v5864_v51 = vsel %vm3569_vm9, %v3563_v10, %v3309_v50 }
 0x269   : > { %3474 = vrot.lane.b32.xlu1 %v2735_v19, %s3790_s27 }
 0x26b   : > { %v3251_v47 = vpop.permute.xlu1 %3250  ;;  %v3313_v25 = vpop.permute.xlu0 %3312 }
 0x26c   : > { %v3557_v44 = vsel %vm3551_vm7, %v3548_v24, %v3251_v47  ;;  %v5869_v31 = vsel %vm3569_vm9, %v3565_v58, %v3313_v25 }
 0x26d   : > { %3478 = vrot.lane.b32.xlu1 %v3007_v43, %s3790_s27 }
 0x26f   : > { %v3255_v33 = vpop.permute.xlu1 %3254  ;;  %v3317_v3 = vpop.permute.xlu0 %3316 }
 0x270   : > { %v3559_v22 = vsel %vm3551_vm7, %v3550_v29, %v3255_v33  ;;  %v5874_v48 = vsel %vm3569_vm9, %v3567_v1, %v3317_v3 }
 0x273   : > { %v3275_v38 = vpop.permute.xlu1 %3274  ;;  %v3337_v15 = vpop.permute.xlu0 %3336 }
 0x274   : > { %v3562_v63 = vsel %vm3560_vm8, %v3553_v12, %v3275_v38  ;;  %v3579_v59 = vsel %vm3578_vm10, %v3570_v21, %v3337_v15 }
 0x277   : > { %v3279_v56 = vpop.permute.xlu1 %3278  ;;  %v3341_v8 = vpop.permute.xlu0 %3340 }
 0x278   : > { %v3564_v11 = vsel %vm3560_vm8, %v3555_v39, %v3279_v56  ;;  %v3581_v27 = vsel %vm3578_vm10, %v5864_v51, %v3341_v8 }
 0x27b   : > { %v3283_v54 = vpop.permute.xlu1 %3282  ;;  %v3345_v5 = vpop.permute.xlu0 %3344 }
 0x27c   : > { %v3566_v28 = vsel %vm3560_vm8, %v3557_v44, %v3283_v54  ;;  %v3583_v39 = vsel %vm3578_vm10, %v5869_v31, %v3345_v5 }
 0x27f   : > { %v3287_v49 = vpop.permute.xlu1 %3286  ;;  %v3349_v52 = vpop.permute.xlu0 %3348 }
 0x280   : > { %v3568_v18 = vsel %vm3560_vm8, %v3559_v22, %v3287_v49  ;;  %v3585_v3 = vsel %vm3578_vm10, %v5874_v48, %v3349_v52 }
 0x283   : > { %v3307_v55 = vpop.permute.xlu1 %3306  ;;  %v3369_v30 = vpop.permute.xlu0 %3368 }
 0x284   : > { %v5881_v45 = vsel %vm3569_vm9, %v3562_v63, %v3307_v55  ;;  %v3588_v46 = vsel %vm3587_vm11, %v3579_v59, %v3369_v30 }
 0x287   : > { %v3311_v57 = vpop.permute.xlu1 %3310  ;;  %v3373_v6 = vpop.permute.xlu0 %3372 }
 0x288   : > { %v5884_v4 = vsel %vm3569_vm9, %v3564_v11, %v3311_v57  ;;  %v3590_v12 = vsel %vm3587_vm11, %v3581_v27, %v3373_v6 }
 0x28b   : > { %v3315_v53 = vpop.permute.xlu1 %3314  ;;  %v3377_v9 = vpop.permute.xlu0 %3376 }
 0x28c   : > { %v5887_v62 = vsel %vm3569_vm9, %v3566_v28, %v3315_v53  ;;  %v3592_v47 = vsel %vm3587_vm11, %v3583_v39, %v3377_v9 }
 0x28f   : > { %v3319_v2 = vpop.permute.xlu1 %3318  ;;  %v3381_v60 = vpop.permute.xlu0 %3380 }
 0x290   : > { %v5890_v13 = vsel %vm3569_vm9, %v3568_v18, %v3319_v2  ;;  %v3594_v38 = vsel %vm3587_vm11, %v3585_v3, %v3381_v60 }
 0x293   : > { %v3339_v0 = vpop.permute.xlu1 %3338  ;;  %v3401_v34 = vpop.permute.xlu0 %3400 }
 0x294   : > { %v3597_v26 = vsel %vm3596_vm12, %v3588_v46, %v3401_v34  ;;  %v3580_v28 = vsel %vm3578_vm10, %v5881_v45, %v3339_v0 }
 0x297   : > { %v3343_v7 = vpop.permute.xlu1 %3342  ;;  %v3405_v61 = vpop.permute.xlu0 %3404 }
 0x298   : > { %v3599_v21 = vsel %vm3596_vm12, %v3590_v12, %v3405_v61  ;;  %v3582_v30 = vsel %vm3578_vm10, %v5884_v4, %v3343_v7 }
 0x29b   : > { %v5892_v36 = vpop.permute.xlu1 %3346  ;;  %v3409_v42 = vpop.permute.xlu0 %3408 }
 0x29c   : > { %v3601_v25 = vsel %vm3596_vm12, %v3592_v47, %v3409_v42  ;;  %v3584_v2 = vsel %vm3578_vm10, %v5887_v62, %v5892_v36 }
 0x29f   : > { %v5894_v40 = vpop.permute.xlu1 %3350  ;;  %v3413_v14 = vpop.permute.xlu0 %3412 }
 0x2a0   : > { %v3603_v31 = vsel %vm3596_vm12, %v3594_v38, %v3413_v14  ;;  %v3586_v61 = vsel %vm3578_vm10, %v5890_v13, %v5894_v40 }
 0x2a3   : > { %v3371_v17 = vpop.permute.xlu1 %3370  ;;  %v3433_v23 = vpop.permute.xlu0 %3432 }
 0x2a4   : > { %v3606_v29 = vsel %vm3605_vm13, %v3597_v26, %v3433_v23  ;;  %v3589_v49 = vsel %vm3587_vm11, %v3580_v28, %v3371_v17 }
 0x2a7   : > { %v3375_v10 = vpop.permute.xlu1 %3374  ;;  %v3437_v37 = vpop.permute.xlu0 %3436 }
 0x2a8   : > { %v3608_v32 = vsel %vm3605_vm13, %v3599_v21, %v3437_v37  ;;  %v3591_v6 = vsel %vm3587_vm11, %v3582_v30, %v3375_v10 }
 0x2ab   : > { %v3379_v41 = vpop.permute.xlu1 %3378  ;;  %v3441_v16 = vpop.permute.xlu0 %3440 }
 0x2ac   : > { %v3610_v43 = vsel %vm3605_vm13, %v3601_v25, %v3441_v16  ;;  %v3593_v4 = vsel %vm3587_vm11, %v3584_v2, %v3379_v41 }
 0x2af   : > { %v5896_v24 = vpop.permute.xlu1 %3382  ;;  %v3445_v58 = vpop.permute.xlu0 %3444 }
 0x2b0   : > { %v3612_v15 = vsel %vm3605_vm13, %v3603_v31, %v3445_v58  ;;  %v3595_v62 = vsel %vm3587_vm11, %v3586_v61, %v5896_v24 }
 0x2b3   : > { %v3403_v1 = vpop.permute.xlu1 %3402  ;;  %v3465_v20 = vpop.permute.xlu0 %3464 }
 0x2b4   : > { %v5905_v35 = vsel %vm3614_vm14, %v3606_v29, %v3465_v20  ;;  %v3598_v52 = vsel %vm3596_vm12, %v3589_v49, %v3403_v1 }
 0x2b5   : > { %3631 = vrot.lane.b32.xlu0 %v5905_v35, %s3791_s28 }
 0x2b7   : > { %v3407_v50 = vpop.permute.xlu1 %3406  ;;  %v3469_v19 = vpop.permute.xlu0 %3468 }
 0x2b8   : > { %v3617_v51 = vsel %vm3614_vm14, %v3608_v32, %v3469_v19  ;;  %v3600_v53 = vsel %vm3596_vm12, %v3591_v6, %v3407_v50 }
 0x2b9   : > { %3635 = vrot.lane.b32.xlu0 %v3617_v51, %s3791_s28 }
 0x2bb   : > { %v3411_v44 = vpop.permute.xlu1 %3410  ;;  %v3473_v33 = vpop.permute.xlu0 %3472 }
 0x2bc   : > { %v3619_v22 = vsel %vm3614_vm14, %v3610_v43, %v3473_v33  ;;  %v3602_v0 = vsel %vm3596_vm12, %v3593_v4, %v3411_v44 }
 0x2bd   : > { %3639 = vrot.lane.b32.xlu0 %v3619_v22, %s3791_s28 }
 0x2bf   : > { %v3415_v63 = vpop.permute.xlu1 %3414  ;;  %v3477_v56 = vpop.permute.xlu0 %3476 }
 0x2c0   : > { %v3621_v8 = vsel %vm3614_vm14, %v3612_v15, %v3477_v56  ;;  %v3604_v36 = vsel %vm3596_vm12, %v3595_v62, %v3415_v63 }
 0x2c1   : > { %3643 = vrot.lane.b32.xlu0 %v3621_v8, %s3791_s28 }
 0x2c3   : > { %v3435_v11 = vpop.permute.xlu1 %3434 }
 0x2c4   : > { %v3607_v18 = vsel %vm3605_vm13, %v3598_v52, %v3435_v11 }
 0x2c7   : > { %v3439_v54 = vpop.permute.xlu1 %3438 }
 0x2c8   : > { %v3609_v45 = vsel %vm3605_vm13, %v3600_v53, %v3439_v54 }
 0x2cb   : > { %v3443_v5 = vpop.permute.xlu1 %3442 }
 0x2cc   : > { %v3611_v34 = vsel %vm3605_vm13, %v3602_v0, %v3443_v5 }
 0x2cf   : > { %v3447_v48 = vpop.permute.xlu1 %3446 }
 0x2d0   : > { %v3613_v14 = vsel %vm3605_vm13, %v3604_v36, %v3447_v48 }
 0x2d3   : > { %v3467_v55 = vpop.permute.xlu1 %3466 }
 0x2d4   : > { %v3616_v57 = vsel %vm3614_vm14, %v3607_v18, %v3467_v55 }
 0x2d5   : > { %3633 = vrot.lane.b32.xlu1 %v3616_v57, %s3791_s28 }
 0x2d7   : > { %v3471_v9 = vpop.permute.xlu1 %3470 }
 0x2d8   : > { %v3618_v60 = vsel %vm3614_vm14, %v3609_v45, %v3471_v9 }
 0x2d9   : > { %3637 = vrot.lane.b32.xlu1 %v3618_v60, %s3791_s28 }
 0x2db   : > { %v3475_v7 = vpop.permute.xlu1 %3474 }
 0x2dc   : > { %v3620_v42 = vsel %vm3614_vm14, %v3611_v34, %v3475_v7 }
 0x2dd   : > { %3641 = vrot.lane.b32.xlu1 %v3620_v42, %s3791_s28 }
 0x2df   : > { %v3479_v17 = vpop.permute.xlu1 %3478 }
 0x2e0   : > { %v3622_v23 = vsel %vm3614_vm14, %v3613_v14, %v3479_v17 }
 0x2e1   : > { %3645 = vrot.lane.b32.xlu1 %v3622_v23, %s3791_s28 }
 0x327   : > { %v3632_v13 = vpop.permute.xlu0 %3631 }
 0x328   : > { %v3656_v40 = vsel %vm3655_vm15, %v5905_v35, %v3632_v13 }
 0x329   : > { %3665 = vst.msk [vmem:[%s118_s2] sm:$0xff] %vm3664_vm0, %v3656_v40 }
 0x32b   : > { %v3636_v10 = vpop.permute.xlu0 %3635 }
 0x32c   : > { %v3658_v37 = vsel %vm3655_vm15, %v3617_v51, %v3636_v10 }
 0x32d   : > { %3667 = vst.msk [vmem:[%s118_s2 + $0x10] sm:$0xff] %vm3664_vm0, %v3658_v37 }
 0x32f   : > { %v3640_v41 = vpop.permute.xlu0 %3639 }
 0x330   : > { %v3660_v16 = vsel %vm3655_vm15, %v3619_v22, %v3640_v41 }
 0x331   : > { %3669 = vst.msk [vmem:[%s118_s2 + $0x20] sm:$0xff] %vm3664_vm0, %v3660_v16 }
 0x333   : > { %v3644_v24 = vpop.permute.xlu0 %3643 }
 0x334   : > { %v3662_v58 = vsel %vm3655_vm15, %v3621_v8, %v3644_v24 }
 0x335   : > { %3671 = vst.msk [vmem:[%s118_s2 + $0x30] sm:$0xff] %vm3664_vm0, %v3662_v58 }
 0x347   : > { %v3634_v59 = vpop.permute.xlu1 %3633 }
 0x348   : > { %v3657_v46 = vsel %vm3655_vm15, %v3616_v57, %v3634_v59 }
 0x349   : > { %3666 = vst.msk [vmem:[%s118_s2 + $0x8] sm:$0xff] %vm3664_vm0, %v3657_v46 }
 0x34b   : > { %v3638_v26 = vpop.permute.xlu1 %3637 }
 0x34c   : > { %v3659_v29 = vsel %vm3655_vm15, %v3618_v60, %v3638_v26 }
 0x34d   : > { %3668 = vst.msk [vmem:[%s118_s2 + $0x18] sm:$0xff] %vm3664_vm0, %v3659_v29 }
 0x34f   : > { %v3642_v1 = vpop.permute.xlu1 %3641 }
 0x350   : > { %v3661_v20 = vsel %vm3655_vm15, %v3620_v42, %v3642_v1 }
 0x351   : > { %3670 = vst.msk [vmem:[%s118_s2 + $0x28] sm:$0xff] %vm3664_vm0, %v3661_v20 }
 0x353   : > { %v3646_v27 = vpop.permute.xlu1 %3645 }
 0x354   : > { %v3663_v35 = vsel %vm3655_vm15, %v3622_v23, %v3646_v27 }
 0x355   : > { %3672 = vst.msk [vmem:[%s118_s2 + $0x38] sm:$0xff] %vm3664_vm0, %v3663_v35 }
 0x356 PF: > { %s11_s6 = sadd.s32 1, %s3772_s6  }
 0x357   : > { %p8_p4 = scmp.ge.s32.totalorder %s11_s6, 4  }
 0x359   :  { %10 = sbr.rel (!%p8_p4) target bundleno = 1 (0x1), region = 54 }

</bundles_post_ra>
